<compile_context>
chip_gen: v5e
topology: v5e:2x2
jax: 0.10.0
libtpu: 0.0.40
codegen_flags: <defaults>
</compile_context>

<pallas_src>
import jax
import jax.numpy as jnp
from jax import lax
from jax.experimental import pallas as pl
from jax.experimental.pallas import tpu as pltpu

BLOCK_SIZE = 64      # max sequence length (tril buffer size in the torch module)
DROPOUT = 0.2        # eval-mode forward: dropout is identity
N_EMBD = 256
HEAD_SIZE = 32

_LANE = 128          # TPU lane width; each of K/Q/V gets its own 128-lane segment


def _head_kernel(x_ref, wqkv_ref, o_ref):
    # x_ref:    (Bb, T, C)   activations (ideally bf16)
    # wqkv_ref: (C, 3*128)   [Wk^T pad | (Wq^T * C^-0.5) pad | Wv^T pad], bf16
    # o_ref:    (Bb, T, 128) zero-padded output slab, bf16
    Bb, T, C = x_ref.shape

    x2d = x_ref[...].reshape(Bb * T, C)
    if x2d.dtype != jnp.bfloat16:
        x2d = x2d.astype(jnp.bfloat16)

    # Fused QKV projection: one MXU matmul, bf16 inputs, f32 accumulation.
    qkv = jnp.dot(x2d, wqkv_ref[...], preferred_element_type=jnp.float32)
    qkv = qkv.reshape(Bb, T, 3 * _LANE)

    # vreg-aligned 128-lane slices (zero padding beyond head_size is harmless:
    # it contributes nothing to the q.k contraction and yields zero output cols).
    k = qkv[..., 0:_LANE].astype(jnp.bfloat16)              # (Bb, T, 128)
    q = qkv[..., _LANE:2 * _LANE].astype(jnp.bfloat16)      # (Bb, T, 128), pre-scaled
    v = qkv[..., 2 * _LANE:3 * _LANE].astype(jnp.bfloat16)  # (Bb, T, 128)

    # scores = (q * C^-0.5) @ k^T ; scale already folded into Wq.
    scores = jnp.einsum('bqd,bkd->bqk', q, k,
                        preferred_element_type=jnp.float32)  # (Bb, T, T)

    # causal mask: tril[:T, :T] == 0  ->  very negative bias
    row = lax.broadcasted_iota(jnp.int32, (T, T), 0)
    col = lax.broadcasted_iota(jnp.int32, (T, T), 1)
    scores = jnp.where((col <= row)[None, :, :], scores, -1e30)

    # numerically stable softmax; normalization deferred past the PV matmul.
    m = jnp.max(scores, axis=-1, keepdims=True)
    p = jnp.exp(scores - m)                                  # (Bb, T, T) unnormalized
    denom = jnp.sum(p, axis=-1, keepdims=True)               # (Bb, T, 1)

    out = jnp.einsum('bqk,bkd->bqd', p.astype(jnp.bfloat16), v,
                     preferred_element_type=jnp.float32)     # (Bb, T, 128)
    out = out * pl.reciprocal(denom, approx=True)            # normalize on small array

    o_ref[...] = out.astype(o_ref.dtype)                     # full 128-lane stores


def prepare_head_weights(w_key, w_query, w_value):
    """One-time weight prep (call at init, not per forward).

    w_*: (head_size, N_EMBD), torch nn.Linear layout (computes x @ W.T).
    Returns a fused, padded, pre-scaled bf16 weight of shape (N_EMBD, 384).
    """
    H, C = w_key.shape
    assert H <= _LANE

    def pad_cols(w_t):  # (C, H) -> (C, 128)
        return jnp.pad(w_t, ((0, 0), (0, _LANE - H)))

    scale = C ** (-0.5)  # matches the torch module: `* C ** (-0.5)` with C = N_EMBD
    wk = pad_cols(w_key.T)
    wq = pad_cols(w_query.T * scale)
    wv = pad_cols(w_value.T)
    return jnp.concatenate([wk, wq, wv], axis=1).astype(jnp.bfloat16)  # (C, 384)


def _pick_block_b(B):
    """Batch tile size: Bb*T >= 256 when B allows, >= ~4 grid steps for big B,
    capped at 64 so the per-step tile stays in the VMEM sweet spot."""
    if B <= 4:
        return B
    return min(64, max(4, B // 4))


def head_forward(x, w_qkv, *, head_size=HEAD_SIZE, block_b=None):
    """x: (B, T, C) activations (bf16 preferred); w_qkv from prepare_head_weights."""
    B, T, C = x.shape
    assert T <= BLOCK_SIZE and C == w_qkv.shape[0]
    S = w_qkv.shape[1]  # 3 * 128

    Bb = block_b if block_b is not None else _pick_block_b(B)
    grid_b = pl.cdiv(B, Bb)
    Bp = grid_b * Bb
    if Bp != B:  # pad batch instead of requiring an exact divisor
        x = jnp.pad(x, ((0, Bp - B), (0, 0), (0, 0)))

    out_padded = pl.pallas_call(
        _head_kernel,
        out_shape=jax.ShapeDtypeStruct((Bp, T, _LANE), jnp.bfloat16),
        grid=(grid_b,),
        in_specs=[
            pl.BlockSpec((Bb, T, C), lambda b: (b, 0, 0)),   # x batch tile
            pl.BlockSpec((C, S), lambda b: (0, 0)),          # fused weight (resident)
        ],
        out_specs=pl.BlockSpec((Bb, T, _LANE), lambda b: (b, 0, 0)),
        compiler_params=pltpu.CompilerParams(
            dimension_semantics=("parallel",),
            vmem_limit_bytes=32 * 1024 * 1024,
        ),
    )(x, w_qkv)

    # TODO(synk): a multi-head consumer could take the padded slab directly;
    # here we slice back to (B, T, head_size) to match the single-Head module.
    return out_padded[:B, :, :head_size]


def _reference(x_f32, w_key, w_query, w_value):
    """Pure-JAX f32 reference of the eval-mode torch forward."""
    B, T, C = x_f32.shape
    k = x_f32 @ w_key.T
    q = x_f32 @ w_query.T
    v = x_f32 @ w_value.T
    w = (q @ jnp.swapaxes(k, -2, -1)) * (C ** -0.5)
    tril = jnp.tril(jnp.ones((T, T), dtype=bool))
    w = jnp.where(tril[None], w, -jnp.inf)
    w = jax.nn.softmax(w, axis=-1)
    return w @ v


if __name__ == "__main__":
    key = jax.random.PRNGKey(0)
    kx, kk, kq, kv = jax.random.split(key, 4)

    B, T, C, H = 2, BLOCK_SIZE, N_EMBD, HEAD_SIZE

    # bf16 activations end-to-end (the kernel's dominant DMA).
    x = jax.random.normal(kx, (B, T, C), dtype=jnp.float32).astype(jnp.bfloat16)

    # torch nn.Linear default init scale ~ U(-1/sqrt(C), 1/sqrt(C)); deterministic here.
    bound = 1.0 / (C ** 0.5)
    w_key = jax.random.uniform(kk, (H, C), jnp.float32, -bound, bound)
    w_query = jax.random.uniform(kq, (H, C), jnp.float32, -bound, bound)
    w_value = jax.random.uniform(kv, (H, C), jnp.float32, -bound, bound)

    w_qkv = prepare_head_weights(w_key, w_query, w_value)   # one-time init

    out = jax.block_until_ready(head_forward(x, w_qkv))
    ref = _reference(x.astype(jnp.float32), w_key, w_query, w_value)

    assert out.shape == (B, T, H)
    out_f32 = out.astype(jnp.float32)
    max_err = jnp.max(jnp.abs(out_f32 - ref))
    # bf16 MXU inputs + approx reciprocal -> tolerance loosened vs f32 ref.
    assert jnp.allclose(out_f32, ref, atol=3e-2, rtol=3e-2), (
        f"mismatch vs reference, max abs err={max_err}")

    print("KERNEL_OK")
</pallas_src>

<mosaic_0001>
module attributes {stable_mosaic.version = 11 : i64} {
  func.func @_head_kernel(%arg0: i32, %arg1: memref<2x64x256xbf16, #tpu.memory_space<vmem>>, %arg2: memref<256x384xbf16, #tpu.memory_space<vmem>>, %arg3: memref<2x64x128xbf16, #tpu.memory_space<vmem>>) attributes {dimension_semantics = [#tpu.dimension_semantics<parallel>], iteration_bounds = array<i64: 1>, scalar_prefetch = 0 : i64, scratch_operands = 0 : i64, tpu.core_type = #tpu.core_type<tc>, window_params = [{transform_indices = @transform_0, window_bounds = array<i64: 2, 64, 256>}, {pipeline_mode = #tpu.pipeline_mode<synchronous>, transform_indices = @transform_1, window_bounds = array<i64: 256, 384>}, {transform_indices = @transform_2, window_bounds = array<i64: 2, 64, 128>}]} {
    %c0 = arith.constant 0 : index
    %c0_0 = arith.constant 0 : index
    %c0_1 = arith.constant 0 : index
    %0 = vector.load %arg1[%c0, %c0_0, %c0_1] : memref<2x64x256xbf16, #tpu.memory_space<vmem>>, vector<2x64x256xbf16>
    %1 = vector.shape_cast %0 : vector<2x64x256xbf16> to vector<128x256xbf16>
    %c0_2 = arith.constant 0 : index
    %c0_3 = arith.constant 0 : index
    %2 = vector.load %arg2[%c0_2, %c0_3] : memref<256x384xbf16, #tpu.memory_space<vmem>>, vector<256x384xbf16>
    %cst = arith.constant dense<0.000000e+00> : vector<128x384xf32>
    %3 = tpu.matmul %1, %2, %cst {dimension_numbers = #tpu.dot_dimension_numbers<[1], [0], [0], [1], [0, 0, 1, 1], [], []>} : vector<128x256xbf16>, vector<256x384xbf16>, vector<128x384xf32> -> vector<128x384xf32>
    %4 = vector.shape_cast %3 : vector<128x384xf32> to vector<2x64x384xf32>
    %5 = vector.extract_strided_slice %4 {offsets = [0, 0, 0], sizes = [2, 64, 128], strides = [1, 1, 1]} : vector<2x64x384xf32> to vector<2x64x128xf32>
    %6 = arith.truncf %5 : vector<2x64x128xf32> to vector<2x64x128xbf16>
    %7 = vector.extract_strided_slice %4 {offsets = [0, 0, 128], sizes = [2, 64, 128], strides = [1, 1, 1]} : vector<2x64x384xf32> to vector<2x64x128xf32>
    %8 = arith.truncf %7 : vector<2x64x128xf32> to vector<2x64x128xbf16>
    %9 = vector.extract_strided_slice %4 {offsets = [0, 0, 256], sizes = [2, 64, 128], strides = [1, 1, 1]} : vector<2x64x384xf32> to vector<2x64x128xf32>
    %10 = arith.truncf %9 : vector<2x64x128xf32> to vector<2x64x128xbf16>
    "tpu.trace_start"() <{level = 10 : i32, message = "bqd,bkd->bqk"}> : () -> ()
    %cst_4 = arith.constant dense<0.000000e+00> : vector<2x64x64xf32>
    %11 = tpu.matmul %8, %6, %cst_4 {dimension_numbers = #tpu.dot_dimension_numbers<[2], [2], [1], [1], [0, 0, 0, 1, 1, 1], [0], [0]>} : vector<2x64x128xbf16>, vector<2x64x128xbf16>, vector<2x64x64xf32> -> vector<2x64x64xf32>
    "tpu.trace_stop"() : () -> ()
    %12 = tpu.iota {dimensions = array<i32: 0>} : vector<64x64xi32>
    %13 = tpu.iota {dimensions = array<i32: 1>} : vector<64x64xi32>
    %14 = arith.cmpi sle, %13, %12 : vector<64x64xi32>
    %15 = vector.shape_cast %14 : vector<64x64xi1> to vector<1x64x64xi1>
    %cst_5 = arith.constant -1.000000e+30 : f32
    %16 = vector.shape_cast %15 : vector<1x64x64xi1> to vector<1x64x64xi1>
    %17 = vector.broadcast %16 : vector<1x64x64xi1> to vector<2x64x64xi1>
    %18 = vector.broadcast %cst_5 : f32 to vector<2x64x64xf32>
    %19 = arith.select %17, %11, %18 : vector<2x64x64xi1>, vector<2x64x64xf32>
    %cst_6 = arith.constant dense<0xFF800000> : vector<2x64xf32>
    %20 = vector.multi_reduction <maximumf>, %19, %cst_6 [2] : vector<2x64x64xf32> to vector<2x64xf32>
    %21 = vector.shape_cast %20 : vector<2x64xf32> to vector<2x64x1xf32>
    %22 = vector.broadcast %21 : vector<2x64x1xf32> to vector<2x64x64xf32>
    %23 = arith.subf %19, %22 : vector<2x64x64xf32>
    %24 = math.exp %23 : vector<2x64x64xf32>
    %cst_7 = arith.constant dense<0.000000e+00> : vector<2x64xf32>
    %25 = vector.multi_reduction <add>, %24, %cst_7 [2] : vector<2x64x64xf32> to vector<2x64xf32>
    %26 = vector.shape_cast %25 : vector<2x64xf32> to vector<2x64x1xf32>
    %27 = arith.truncf %24 : vector<2x64x64xf32> to vector<2x64x64xbf16>
    "tpu.trace_start"() <{level = 10 : i32, message = "bqk,bkd->bqd"}> : () -> ()
    %cst_8 = arith.constant dense<0.000000e+00> : vector<2x64x128xf32>
    %28 = tpu.matmul %27, %10, %cst_8 {dimension_numbers = #tpu.dot_dimension_numbers<[2], [1], [1], [2], [0, 0, 0, 1, 1, 2], [0], [0]>} : vector<2x64x64xbf16>, vector<2x64x128xbf16>, vector<2x64x128xf32> -> vector<2x64x128xf32>
    "tpu.trace_stop"() : () -> ()
    %29 = tpu.reciprocal %26 {approx = true} : vector<2x64x1xf32> -> vector<2x64x1xf32>
    %30 = vector.broadcast %29 : vector<2x64x1xf32> to vector<2x64x128xf32>
    %31 = arith.mulf %28, %30 : vector<2x64x128xf32>
    %32 = arith.truncf %31 : vector<2x64x128xf32> to vector<2x64x128xbf16>
    %c0_9 = arith.constant 0 : index
    %c0_10 = arith.constant 0 : index
    %c0_11 = arith.constant 0 : index
    %33 = vector.load %arg3[%c0_9, %c0_10, %c0_11] : memref<2x64x128xbf16, #tpu.memory_space<vmem>>, vector<2x64x128xbf16>
    tpu.vector_store %arg3[%c0_9, %c0_10, %c0_11], %32 {strides = array<i32>} : memref<2x64x128xbf16, #tpu.memory_space<vmem>>, vector<2x64x128xbf16>,
    return
  }
  func.func @transform_0(%arg0: i32) -> (i32, i32, i32) {
    %c0_i32 = arith.constant 0 : i32
    %c0_i32_0 = arith.constant 0 : i32
    %c0_i32_1 = arith.constant 0 : i32
    return %arg0, %c0_i32, %c0_i32_0 : i32, i32, i32
  }
  func.func @transform_1(%arg0: i32) -> (i32, i32) {
    %c0_i32 = arith.constant 0 : i32
    %c0_i32_0 = arith.constant 0 : i32
    %c0_i32_1 = arith.constant 0 : i32
    return %c0_i32, %c0_i32_0 : i32, i32
  }
  func.func @transform_2(%arg0: i32) -> (i32, i32, i32) {
    %c0_i32 = arith.constant 0 : i32
    %c0_i32_0 = arith.constant 0 : i32
    %c0_i32_1 = arith.constant 0 : i32
    return %arg0, %c0_i32, %c0_i32_0 : i32, i32, i32
  }
}

</mosaic_0001>

<bundles_post_ra>
// kernel: tpu_custom_call.1
= control target key start
LH: loop header
LB: loop body
LE: loop exit
PB: predicated region body
PF: predicated region fallthrough
CT: control target
= control target key end

     0   :  { %7 = vsyncpa [#allocation3], 0  ;;  %s2326_s0 = inlined_call_operand.hbm [shape: bf16[2,64,256], index: 0, kind: input, shape index: {}]   ;;  %s2327_s1 = inlined_call_operand.hbm [shape: bf16[256,384], index: 1, kind: input, shape index: {}]   ;;  %s2328_s2 = inlined_call_operand.hbm [shape: bf16[2,64,128], index: 2, kind: output, shape index: {}]  }
   0x1   :  { %8 = vsyncpa [#allocation6], 0 }
   0x2   :  { %9 = vsyncpa [#allocation4], 0  ;;  %s14_s11 = sshll.u32 %s2326_s0, 4  ;;  %s1949_s12 = smov [#allocation2]   ;;  %s15_s11 = int_to_ptr.hbm [resolvable:$true] %s14_s11 }
   0x3   :  { %s16_s13 = sshll.u32 %s1949_s12, 4  ;;  %s27_s16 = sshll.u32 %s2327_s1, 4  ;;  %s17_s13 = int_to_ptr.vmem [resolvable:$true] %s16_s13  ;;  %s28_s16 = int_to_ptr.hbm [resolvable:$true] %s27_s16 }
   0x4   :  { %s1950_s17 = smov 128   ;;  %s1951_s18 = smov 8  }
   0x5   :  { %22 = dma.hbm_to_vmem [thread:$0]  %s15_s11, 2048, %s17_s13, [#allocation3], %s1950_s17, %s1950_s17, %s1951_s18  }
   0x6   :  { %s1952_s19 = smov [#allocation5]   ;;  %s1953_s21 = smov 192  }
   0x7   :  { %s29_s20 = sshll.u32 %s1952_s19, 4  ;;  %s1954_s22 = smov 12   ;;  %s30_s20 = int_to_ptr.vmem [resolvable:$true] %s29_s20 }
   0x8   :  { %35 = dma.hbm_to_vmem [thread:$0]  %s28_s16, 6144, %s30_s20, [#allocation6], %s1953_s21, %s1953_s21, %s1954_s22  }
   0x9   :  { %1943 = dma.done.wait [#allocation3], 2048  }
   0xa   :  { %1944 = vsyncadd [#allocation3], 4294965248 }
   0xb   :  { %1945 = dma.done.wait [#allocation6], 6144  }
   0xc   :  { %1946 = vsyncadd [#allocation6], 4294961152  ;;  %v1573_v0 = vld [vmem:[#allocation5 + $0xa8] sm:$0xf]  ;;  %v1725_v1 = vld [vmem:[#allocation5 + $0xb0] sm:$0xf0] }
   0xd   :  { %v1669_v2 = vld [vmem:[#allocation5 + $0x168] sm:$0xf]  ;;  %v1574_v3 = vor.u32 %v1725_v1, %v1573_v0  ;;  %v1749_v4 = vld [vmem:[#allocation5 + $0x170] sm:$0xf0]  ;;  %v1561_v5 = vld [vmem:[#allocation5 + $0x90] sm:$0xf] }
   0xe   :  { %v1722_v6 = vld [vmem:[#allocation5 + $0x98] sm:$0xf0]  ;;  %v1670_v7 = vor.u32 %v1749_v4, %v1669_v2  ;;  %v1657_v8 = vld [vmem:[#allocation5 + $0x150] sm:$0xf]  ;;  %v1549_v12 = vld [vmem:[#allocation5 + $0x78] sm:$0xf] }
   0xf   :  { %v1746_v9 = vld [vmem:[#allocation5 + $0x158] sm:$0xf0]  ;;  %461 = vmatpush.bf16.msra.mxu0 %v1574_v3  ;;  %v1562_v10 = vor.u32 %v1722_v6, %v1561_v5  ;;  %v1719_v13 = vld [vmem:[#allocation5 + $0x80] sm:$0xf0]  ;;  %v1645_v14 = vld [vmem:[#allocation5 + $0x138] sm:$0xf] }
  0x10   :  { %510 = vmatpush.bf16.msra.mxu1 %v1670_v7  ;;  %v1658_v11 = vor.u32 %v1746_v9, %v1657_v8  ;;  %v1743_v15 = vld [vmem:[#allocation5 + $0x140] sm:$0xf0]  ;;  %v1550_v16 = vor.u32 %v1719_v13, %v1549_v12  ;;  %v1537_v18 = vld [vmem:[#allocation5 + $0x60] sm:$0xf]  ;;  %v1716_v19 = vld [vmem:[#allocation5 + $0x68] sm:$0xf0] }
  0x11   :  { %v1646_v17 = vor.u32 %v1743_v15, %v1645_v14  ;;  %v1633_v20 = vld [vmem:[#allocation5 + $0x120] sm:$0xf]  ;;  %v1740_v21 = vld [vmem:[#allocation5 + $0x128] sm:$0xf0]  ;;  %v1538_v22 = vor.u32 %v1716_v19, %v1537_v18  ;;  %v1525_v24 = vld [vmem:[#allocation5 + $0x48] sm:$0xf] }
  0x12   :  { %v1634_v23 = vor.u32 %v1740_v21, %v1633_v20  ;;  %v1713_v25 = vld [vmem:[#allocation5 + $0x50] sm:$0xf0]  ;;  %v1621_v26 = vld [vmem:[#allocation5 + $0x108] sm:$0xf]  ;;  %v1513_v30 = vld [vmem:[#allocation5 + $0x30] sm:$0xf] }
  0x13   :  { %462 = vmatpush.bf16.msra.mxu0 %v1562_v10  ;;  %v1737_v27 = vld [vmem:[#allocation5 + $0x110] sm:$0xf0]  ;;  %v1526_v28 = vor.u32 %v1713_v25, %v1525_v24  ;;  %v1710_v31 = vld [vmem:[#allocation5 + $0x38] sm:$0xf0]  ;;  %v1609_v32 = vld [vmem:[#allocation5 + $0xf0] sm:$0xf] }
  0x14   :  { %511 = vmatpush.bf16.msra.mxu1 %v1658_v11  ;;  %v1622_v29 = vor.u32 %v1737_v27, %v1621_v26  ;;  %v1734_v33 = vld [vmem:[#allocation5 + $0xf8] sm:$0xf0]  ;;  %v1514_v34 = vor.u32 %v1710_v31, %v1513_v30  ;;  %v1501_v36 = vld [vmem:[#allocation5 + $0x18] sm:$0xf]  ;;  %v1707_v37 = vld [vmem:[#allocation5 + $0x20] sm:$0xf0] }
  0x15   :  { %v1610_v35 = vor.u32 %v1734_v33, %v1609_v32  ;;  %v1597_v38 = vld [vmem:[#allocation5 + $0xd8] sm:$0xf]  ;;  %v1731_v39 = vld [vmem:[#allocation5 + $0xe0] sm:$0xf0]  ;;  %v1502_v40 = vor.u32 %v1707_v37, %v1501_v36  ;;  %v1489_v42 = vld [vmem:[#allocation5] sm:$0xf] }
  0x16   :  { %v1598_v41 = vor.u32 %v1731_v39, %v1597_v38  ;;  %v1704_v43 = vld [vmem:[#allocation5 + $0x8] sm:$0xf0]  ;;  %v1585_v44 = vld [vmem:[#allocation5 + $0xc0] sm:$0xf]  ;;  %v1688_v48 = vld [vmem:[#allocation2 + $0x4] sm:$0xf0] }
  0x17   :  { %463 = vmatpush.bf16.msra.mxu0 %v1550_v16  ;;  %v1728_v45 = vld [vmem:[#allocation5 + $0xc8] sm:$0xf0]  ;;  %v1490_v46 = vor.u32 %v1704_v43, %v1489_v42  ;;  %v1425_v47 = vld [vmem:[#allocation2] sm:$0xf]  ;;  %v1687_v50 = vld [vmem:[#allocation2 + $0x4] sm:$0xf] }
  0x18   :  { %512 = vmatpush.bf16.msra.mxu1 %v1646_v17  ;;  %v1586_v49 = vor.u32 %v1728_v45, %v1585_v44  ;;  %v1427_v51 = vld [vmem:[#allocation2 + $0x8] sm:$0xf0]  ;;  %v1979_v52 = vor.u32 %v1688_v48, %v1425_v47  ;;  %v1575_v55 = vld [vmem:[#allocation5 + $0xb4] sm:$0xf0]  ;;  %v1721_v59 = vld [vmem:[#allocation5 + $0x94] sm:$0xf] }
  0x19   :  { %v1981_v53 = vor.u32 %v1687_v50, %v1427_v51  ;;  %v1724_v54 = vld [vmem:[#allocation5 + $0xac] sm:$0xf]  ;;  %v1671_v58 = vld [vmem:[#allocation5 + $0x174] sm:$0xf0]  ;;  %v1563_v60 = vld [vmem:[#allocation5 + $0x9c] sm:$0xf0] }
  0x1a   :  { %v1748_v56 = vld [vmem:[#allocation5 + $0x16c] sm:$0xf]  ;;  %v1578_v57 = vor.u32 %v1724_v54, %v1575_v55  ;;  %v1745_v62 = vld [vmem:[#allocation5 + $0x154] sm:$0xf]  ;;  %v1659_v63 = vld [vmem:[#allocation5 + $0x15c] sm:$0xf0]  ;;  %v1566_v0 = vor.u32 %v1721_v59, %v1563_v60 }
  0x1b   :  { %464 = vmatpush.bf16.msra.mxu0 %v1538_v22  ;;  %v1674_v61 = vor.u32 %v1748_v56, %v1671_v58  ;;  %v1662_v1 = vor.u32 %v1745_v62, %v1659_v63  ;;  %v1718_v2 = vld [vmem:[#allocation5 + $0x7c] sm:$0xf]  ;;  %v1551_v3 = vld [vmem:[#allocation5 + $0x84] sm:$0xf0]  ;;  %v1433_v5 = vld [vmem:[#allocation2 + $0x10] sm:$0xf] }
  0x1c   :  { %513 = vmatpush.bf16.msra.mxu1 %v1634_v23  ;;  %559 = vmatpush.bf16.msra.mxu2 %v1578_v57  ;;  %v1742_v4 = vld [vmem:[#allocation5 + $0x13c] sm:$0xf]  ;;  %v1690_v6 = vld [vmem:[#allocation2 + $0x14] sm:$0xf0]  ;;  %v1554_v7 = vor.u32 %v1718_v2, %v1551_v3  ;;  %v1647_v8 = vld [vmem:[#allocation5 + $0x144] sm:$0xf0] }
  0x1d   :  { %608 = vmatpush.bf16.msra.mxu3 %v1674_v61  ;;  %v1689_v9 = vld [vmem:[#allocation2 + $0x14] sm:$0xf]  ;;  %v1435_v10 = vld [vmem:[#allocation2 + $0x18] sm:$0xf0]  ;;  %v1650_v11 = vor.u32 %v1742_v4, %v1647_v8  ;;  %v1985_v12 = vor.u32 %v1690_v6, %v1433_v5  ;;  %v1715_v13 = vld [vmem:[#allocation5 + $0x64] sm:$0xf] }
  0x1e   :  { %v1539_v14 = vld [vmem:[#allocation5 + $0x6c] sm:$0xf0]  ;;  %v1739_v15 = vld [vmem:[#allocation5 + $0x124] sm:$0xf]  ;;  %v1987_v16 = vor.u32 %v1689_v9, %v1435_v10  ;;  %v1712_v20 = vld [vmem:[#allocation5 + $0x4c] sm:$0xf] }
  0x1f   :  { %465 = vmatpush.bf16.msra.mxu0 %v1526_v28  ;;  %v1542_v17 = vor.u32 %v1715_v13, %v1539_v14  ;;  %v1635_v18 = vld [vmem:[#allocation5 + $0x12c] sm:$0xf0]  ;;  %v1527_v21 = vld [vmem:[#allocation5 + $0x54] sm:$0xf0]  ;;  %v1736_v22 = vld [vmem:[#allocation5 + $0x10c] sm:$0xf] }
  0x20   :  { %514 = vmatpush.bf16.msra.mxu1 %v1622_v29  ;;  %560 = vmatpush.bf16.msra.mxu2 %v1566_v0  ;;  %v1638_v19 = vor.u32 %v1739_v15, %v1635_v18  ;;  %v1530_v23 = vor.u32 %v1712_v20, %v1527_v21  ;;  %v1623_v24 = vld [vmem:[#allocation5 + $0x114] sm:$0xf0]  ;;  %v1709_v25 = vld [vmem:[#allocation5 + $0x34] sm:$0xf]  ;;  %v1515_v26 = vld [vmem:[#allocation5 + $0x3c] sm:$0xf0] }
  0x21   :  { %609 = vmatpush.bf16.msra.mxu3 %v1662_v1  ;;  %v1626_v27 = vor.u32 %v1736_v22, %v1623_v24  ;;  %v1733_v28 = vld [vmem:[#allocation5 + $0xf4] sm:$0xf]  ;;  %v1611_v29 = vld [vmem:[#allocation5 + $0xfc] sm:$0xf0]  ;;  %v1518_v30 = vor.u32 %v1709_v25, %v1515_v26  ;;  %v1706_v32 = vld [vmem:[#allocation5 + $0x1c] sm:$0xf] }
  0x22   :  { %v1614_v31 = vor.u32 %v1733_v28, %v1611_v29  ;;  %v1503_v33 = vld [vmem:[#allocation5 + $0x24] sm:$0xf0]  ;;  %v1691_v39 = vld [vmem:[#allocation2 + $0x24] sm:$0xf]  ;;  %v1491_v44 = vld [vmem:[#allocation5 + $0xc] sm:$0xf0] }
  0x23   :  { %466 = vmatpush.bf16.msra.mxu0 %v1514_v34  ;;  %v1730_v34 = vld [vmem:[#allocation5 + $0xdc] sm:$0xf]  ;;  %v1692_v36 = vld [vmem:[#allocation2 + $0x24] sm:$0xf0]  ;;  %v1506_v37 = vor.u32 %v1706_v32, %v1503_v33  ;;  %v1703_v43 = vld [vmem:[#allocation5 + $0x4] sm:$0xf] }
  0x24   :  { %515 = vmatpush.bf16.msra.mxu1 %v1610_v35  ;;  %561 = vmatpush.bf16.msra.mxu2 %v1554_v7  ;;  %v1441_v35 = vld [vmem:[#allocation2 + $0x20] sm:$0xf]  ;;  %v1599_v38 = vld [vmem:[#allocation5 + $0xe4] sm:$0xf0]  ;;  %v1727_v45 = vld [vmem:[#allocation5 + $0xc4] sm:$0xf]  ;;  %v1494_v47 = vor.u32 %v1703_v43, %v1491_v44 }
  0x25   :  { %610 = vmatpush.bf16.msra.mxu3 %v1650_v11  ;;  %v1991_v42 = vor.u32 %v1692_v36, %v1441_v35  ;;  %v1587_v48 = vld [vmem:[#allocation5 + $0xcc] sm:$0xf0]  ;;  %v1694_v51 = vld [vmem:[#allocation2 + $0x34] sm:$0xf0]  ;;  %v1693_v54 = vld [vmem:[#allocation2 + $0x34] sm:$0xf] }
  0x26   :  { %v1449_v50 = vld [vmem:[#allocation2 + $0x30] sm:$0xf]  ;;  %v1451_v55 = vld [vmem:[#allocation2 + $0x38] sm:$0xf0]  ;;  %v1457_v58 = vld [vmem:[#allocation2 + $0x40] sm:$0xf] }
  0x27   :  { %467 = vmatpush.bf16.msra.mxu0 %v1502_v40  ;;  %v1443_v40 = vld [vmem:[#allocation2 + $0x28] sm:$0xf0]  ;;  %v1999_v56 = vor.u32 %v1694_v51, %v1449_v50  ;;  %v2001_v57 = vor.u32 %v1693_v54, %v1451_v55  ;;  %v1696_v59 = vld [vmem:[#allocation2 + $0x44] sm:$0xf0]  ;;  %v1695_v60 = vld [vmem:[#allocation2 + $0x44] sm:$0xf] }
  0x28   :  { %516 = vmatpush.bf16.msra.mxu1 %v1598_v41  ;;  %562 = vmatpush.bf16.msra.mxu2 %v1542_v17  ;;  %v1602_v41 = vor.u32 %v1730_v34, %v1599_v38  ;;  %v1459_v61 = vld [vmem:[#allocation2 + $0x48] sm:$0xf0]  ;;  %v2007_v62 = vor.u32 %v1696_v59, %v1457_v58  ;;  %v1465_v0 = vld [vmem:[#allocation2 + $0x50] sm:$0xf]  ;;  %v1698_v1 = vld [vmem:[#allocation2 + $0x54] sm:$0xf0] }
  0x29   :  { %611 = vmatpush.bf16.msra.mxu3 %v1638_v19  ;;  %v2009_v63 = vor.u32 %v1695_v60, %v1459_v61  ;;  %v1697_v2 = vld [vmem:[#allocation2 + $0x54] sm:$0xf]  ;;  %v1467_v3 = vld [vmem:[#allocation2 + $0x58] sm:$0xf0]  ;;  %v2015_v4 = vor.u32 %v1698_v1, %v1465_v0  ;;  %v1473_v6 = vld [vmem:[#allocation2 + $0x60] sm:$0xf] }
  0x2a   :  { %v2017_v5 = vor.u32 %v1697_v2, %v1467_v3  ;;  %v1700_v7 = vld [vmem:[#allocation2 + $0x64] sm:$0xf0]  ;;  %v1699_v8 = vld [vmem:[#allocation2 + $0x64] sm:$0xf]  ;;  %v1475_v9 = vld [vmem:[#allocation2 + $0x68] sm:$0xf0] }
  0x2b   :  { %468 = vmatpush.bf16.msra.mxu0 %v1490_v46  ;;  %v1993_v46 = vor.u32 %v1691_v39, %v1443_v40  ;;  %v2023_v10 = vor.u32 %v1700_v7, %v1473_v6  ;;  %v2025_v11 = vor.u32 %v1699_v8, %v1475_v9  ;;  %v1481_v13 = vld [vmem:[#allocation2 + $0x70] sm:$0xf]  ;;  %v1702_v14 = vld [vmem:[#allocation2 + $0x74] sm:$0xf0]  ;;  %v1701_v15 = vld [vmem:[#allocation2 + $0x74] sm:$0xf] }
  0x2c   :  { %517 = vmatpush.bf16.msra.mxu1 %v1586_v49  ;;  %563 = vmatpush.bf16.msra.mxu2 %v1530_v23  ;;  %v1590_v49 = vor.u32 %v1727_v45, %v1587_v48  ;;  %v1483_v17 = vld [vmem:[#allocation2 + $0x78] sm:$0xf0]  ;;  %v2031_v18 = vor.u32 %v1702_v14, %v1481_v13  ;;  %v1677_v33 = vld [vmem:[#allocation5 + $0x170] sm:$0xf]  ;;  %v1723_v38 = vld [vmem:[#allocation5 + $0xa0] sm:$0xf0] }
  0x2d   :  { %612 = vmatpush.bf16.msra.mxu3 %v1626_v27  ;;  %v2033_v19 = vor.u32 %v1701_v15, %v1483_v17  ;;  %v1726_v32 = vld [vmem:[#allocation5 + $0xb8] sm:$0xf0]  ;;  %v1665_v39 = vld [vmem:[#allocation5 + $0x158] sm:$0xf]  ;;  %v1557_v48 = vld [vmem:[#allocation5 + $0x80] sm:$0xf] }
  0x2e   :  { %469 = vmatmul.bf16.vlgmr.msra.gmra.mxu0 %v1979_v52  ;;  %v1750_v35 = vld [vmem:[#allocation5 + $0x178] sm:$0xf0]  ;;  %v1653_v50 = vld [vmem:[#allocation5 + $0x140] sm:$0xf]  ;;  %v1744_v55 = vld [vmem:[#allocation5 + $0x148] sm:$0xf0] }
  0x2f   :  { %518 = vmatmul.bf16.vlgmr.msra.gmra.mxu1 %v1981_v53  ;;  %v1678_v36 = vor.u32 %v1750_v35, %v1677_v33  ;;  %v1654_v58 = vor.u32 %v1744_v55, %v1653_v50  ;;  %v1545_v59 = vld [vmem:[#allocation5 + $0x68] sm:$0xf]  ;;  %v1717_v60 = vld [vmem:[#allocation5 + $0x70] sm:$0xf0]  ;;  %v1533_v7 = vld [vmem:[#allocation5 + $0x50] sm:$0xf] }
  0x30   :  { %564 = vmatpush.bf16.msra.mxu2 %v1518_v30  ;;  %v1641_v61 = vld [vmem:[#allocation5 + $0x128] sm:$0xf]  ;;  %v1546_v0 = vor.u32 %v1717_v60, %v1545_v59  ;;  %v1741_v1 = vld [vmem:[#allocation5 + $0x130] sm:$0xf0]  ;;  %v1714_v8 = vld [vmem:[#allocation5 + $0x58] sm:$0xf0] }
  0x31   :  { %613 = vmatpush.bf16.msra.mxu3 %v1614_v31  ;;  %v1581_v31 = vld [vmem:[#allocation5 + $0xb0] sm:$0xf]  ;;  %706 = vmatpush.bf16.msrb.mxu1 %v1678_v36  ;;  %v1642_v2 = vor.u32 %v1741_v1, %v1641_v61  ;;  %v1534_v13 = vor.u32 %v1714_v8, %v1533_v7  ;;  %v1738_v14 = vld [vmem:[#allocation5 + $0x118] sm:$0xf0]  ;;  %v1735_v35 = vld [vmem:[#allocation5 + $0x100] sm:$0xf0] }
  0x32   :  { %v1582_v34 = vor.u32 %v1726_v32, %v1581_v31  ;;  %v1629_v9 = vld [vmem:[#allocation5 + $0x110] sm:$0xf]  ;;  %v1711_v31 = vld [vmem:[#allocation5 + $0x40] sm:$0xf0]  ;;  %v1617_v32 = vld [vmem:[#allocation5 + $0xf8] sm:$0xf] }
  0x33   :  { %v1630_v17 = vor.u32 %v1738_v14, %v1629_v9  ;;  %v1618_v36 = vor.u32 %v1735_v35, %v1617_v32  ;;  %v1732_v50 = vld [vmem:[#allocation5 + $0xe8] sm:$0xf0]  ;;  %v1497_v60 = vld [vmem:[#allocation5 + $0x8] sm:$0xf]  ;;  %v1705_v61 = vld [vmem:[#allocation5 + $0x10] sm:$0xf0] }
  0x34   :  { %565 = vmatpush.bf16.msra.mxu2 %v1506_v37  ;;  %657 = vmatpush.bf16.msrb.mxu0 %v1582_v34  ;;  %v1569_v37 = vld [vmem:[#allocation5 + $0x98] sm:$0xf]  ;;  %v1498_v7 = vor.u32 %v1705_v61, %v1497_v60  ;;  %v1729_v8 = vld [vmem:[#allocation5 + $0xd0] sm:$0xf0]  ;;  %vm1008_vm1 = vcmask 523264   ;;  %s1955_s0 = smov [#allocation7]  }
  0x35   :  { %614 = vmatpush.bf16.msra.mxu3 %v1602_v41  ;;  %v1570_v40 = vor.u32 %v1723_v38, %v1569_v37  ;;  %v1747_v41 = vld [vmem:[#allocation5 + $0x160] sm:$0xf0]  ;;  %s1407_s1 = sshll.u32 %s1955_s0, 4  ;;  %s1409_s25 = sshll.u32 %s2328_s2, 4  ;;  %s1408_s1 = int_to_ptr.vmem [resolvable:$true] %s1407_s1  ;;  %s1410_s25 = int_to_ptr.hbm [resolvable:$true] %s1409_s25 }
  0x36   :  { %v1666_v43 = vor.u32 %v1747_v41, %v1665_v39  ;;  %v1509_v39 = vld [vmem:[#allocation5 + $0x20] sm:$0xf]  ;;  %s1956_s26 = smov 64   ;;  %s1957_s27 = smov 4  }
  0x37   :  { %v1605_v41 = vld [vmem:[#allocation5 + $0xe0] sm:$0xf] }
  0x38   :  { %566 = vmatpush.bf16.msra.mxu2 %v1494_v47  ;;  %658 = vmatpush.bf16.msrb.mxu0 %v1570_v40  ;;  %v1708_v40 = vld [vmem:[#allocation5 + $0x28] sm:$0xf0] }
  0x39   :  { %615 = vmatpush.bf16.msra.mxu3 %v1590_v49  ;;  %707 = vmatpush.bf16.msrb.mxu1 %v1666_v43  ;;  %v1720_v49 = vld [vmem:[#allocation5 + $0x88] sm:$0xf0] }
  0x3a   :  { %v1558_v54 = vor.u32 %v1720_v49, %v1557_v48  ;;  %v1510_v49 = vor.u32 %v1708_v40, %v1509_v39 }
  0x3b   :  { %567 = vmatmul.bf16.vlgmr.msra.gmra.mxu2 %v1979_v52 }
  0x3c   :  { %616 = vmatmul.bf16.vlgmr.msra.gmra.mxu3 %v1981_v53  ;;  %659 = vmatpush.bf16.msrb.mxu0 %v1558_v54  ;;  %v1606_v54 = vor.u32 %v1732_v50, %v1605_v41 }
  0x3d   :  { %708 = vmatpush.bf16.msrb.mxu1 %v1654_v58 }
  0x3e   :  { %474 = vmatmul.bf16.gmra.mxu0 %v1985_v12 }
  0x3f   :  { %523 = vmatmul.bf16.gmra.mxu1 %v1987_v16 }
  0x40   :  { %660 = vmatpush.bf16.msrb.mxu0 %v1546_v0  ;;  %v1593_v0 = vld [vmem:[#allocation5 + $0xc8] sm:$0xf] }
  0x41   :  { %709 = vmatpush.bf16.msrb.mxu1 %v1642_v2  ;;  %v1594_v9 = vor.u32 %v1729_v8, %v1593_v0 }
  0x44   :  { %661 = vmatpush.bf16.msrb.mxu0 %v1534_v13 }
  0x45   :  { %710 = vmatpush.bf16.msrb.mxu1 %v1630_v17 }
  0x49   :  { %711 = vmatpush.bf16.msrb.mxu1 %v1618_v36 }
  0x4b   :  { %572 = vmatmul.bf16.gmra.mxu2 %v1985_v12 }
  0x4c   :  { %621 = vmatmul.bf16.gmra.mxu3 %v1987_v16 }
  0x4d   :  { %712 = vmatpush.bf16.msrb.mxu1 %v1606_v54 }
  0x4e   :  { %479 = vmatmul.bf16.gmra.mxu0 %v1991_v42 }
  0x4f   :  { %528 = vmatmul.bf16.gmra.mxu1 %v1993_v46 }
  0x51   :  { %713 = vmatpush.bf16.msrb.mxu1 %v1594_v9 }
  0x5b   :  { %577 = vmatmul.bf16.gmra.mxu2 %v1991_v42 }
  0x5c   :  { %626 = vmatmul.bf16.gmra.mxu3 %v1993_v46 }
  0x5e   :  { %484 = vmatmul.bf16.gmra.mxu0 %v1999_v56 }
  0x5f   :  { %533 = vmatmul.bf16.gmra.mxu1 %v2001_v57 }
  0x6b   :  { %582 = vmatmul.bf16.gmra.mxu2 %v1999_v56 }
  0x6c   :  { %631 = vmatmul.bf16.gmra.mxu3 %v2001_v57 }
  0x6e   :  { %489 = vmatmul.bf16.gmra.mxu0 %v2007_v62 }
  0x6f   :  { %538 = vmatmul.bf16.gmra.mxu1 %v2009_v63 }
  0x7b   :  { %587 = vmatmul.bf16.gmra.mxu2 %v2007_v62 }
  0x7c   :  { %636 = vmatmul.bf16.gmra.mxu3 %v2009_v63 }
  0x7e   :  { %494 = vmatmul.bf16.gmra.mxu0 %v2015_v4 }
  0x7f   :  { %543 = vmatmul.bf16.gmra.mxu1 %v2017_v5 }
  0x8b   :  { %592 = vmatmul.bf16.gmra.mxu2 %v2015_v4 }
  0x8c   :  { %641 = vmatmul.bf16.gmra.mxu3 %v2017_v5 }
  0x8e   :  { %499 = vmatmul.bf16.gmra.mxu0 %v2023_v10 }
  0x8f   :  { %548 = vmatmul.bf16.gmra.mxu1 %v2025_v11 }
  0x9b   :  { %597 = vmatmul.bf16.gmra.mxu2 %v2023_v10 }
  0x9c   :  { %646 = vmatmul.bf16.gmra.mxu3 %v2025_v11 }
  0x9e   :  { %504 = vmatmul.bf16.gmra.mxu0 %v2031_v18 }
  0x9f   :  { %553 = vmatmul.bf16.gmra.mxu1 %v2033_v19 }
  0xab   :  { %v470_v20 = vpop.f32.mrf.mxu0  ;;  %602 = vmatmul.bf16.gmra.mxu2 %v2031_v18 }
  0xac   :  { %v519_v21 = vpop.f32.mrf.mxu1  ;;  %651 = vmatmul.bf16.gmra.mxu3 %v2033_v19 }
  0xad   :  { %v2039_v22 = vadd.f32 %v519_v21, %v470_v20  ;;  %v1521_v21 = vld [vmem:[#allocation5 + $0x38] sm:$0xf] }
  0xae   :  { %v1522_v34 = vor.u32 %v1711_v31, %v1521_v21 }
  0xaf   :  { %714 = vmatmul.bf16.vlgmr.msrb.gmra.mxu1 %v1981_v53 }
  0xb0   :  { %662 = vmatpush.bf16.msrb.mxu0 %v1522_v34 }
  0xb3   :  { %v2043_v23 = vpop.f32.mrf.mxu0 }
  0xb4   :  { %v2045_v24 = vpop.f32.mrf.mxu1  ;;  %663 = vmatpush.bf16.msrb.mxu0 %v1510_v49 }
  0xb8   :  { %664 = vmatpush.bf16.msrb.mxu0 %v1498_v7 }
  0xbb   :  { %v2047_v25 = vpop.f32.mrf.mxu0  ;;  %665 = vmatmul.bf16.vlgmr.msrb.gmra.mxu0 %v1979_v52  ;;  %v522_v52 = vadd.f32 %v2045_v24, %v2043_v23  ;;  %v755_v23 = vpack.c.bf16 %v2039_v22, %v2039_v22 }
  0xbc   :  { %v2049_v26 = vpop.f32.mrf.mxu1 }
  0xbd   :  { %v525_v31 = vadd.f32 %v2049_v26, %v2047_v25  ;;  %v756_v26 = vpack.c.bf16 %v522_v52, %v522_v52  ;;  %v835_v0 = vunpack.c.l.b16 %v755_v23 }
  0xbe   :  { %v2061_v47 = vpop.f32.mrf.mxu2 }
  0xbf   :  { %v2063_v51 = vpop.f32.mrf.mxu3  ;;  %v757_v39 = vpack.c.bf16 %v525_v31, %v525_v31  ;;  %v836_v61 = vunpack.c.l.b16 %v756_v26  ;;  %719 = vmatmul.bf16.gmra.mxu1 %v1987_v16 }
  0xc1   :  { %v837_v53 = vunpack.c.l.b16 %v757_v39  ;;  %v843_v7 = vpack.c.b16 %v836_v61, %v835_v0 }
  0xc3   :  { %v2053_v27 = vpop.f32.mrf.mxu0 }
  0xc4   :  { %v2055_v28 = vpop.f32.mrf.mxu1 }
  0xc6   :  { %v2065_v15 = vpop.f32.mrf.mxu2 }
  0xc7   :  { %v2067_v20 = vpop.f32.mrf.mxu3 }
  0xc8   :  { %v620_v60 = vadd.f32 %v2067_v20, %v2065_v15 }
  0xcb   :  { %v2057_v29 = vpop.f32.mrf.mxu0  ;;  %670 = vmatmul.bf16.gmra.mxu0 %v1985_v12 }
  0xcc   :  { %v2059_v30 = vpop.f32.mrf.mxu1 }
  0xcd   :  { %v530_v1 = vadd.f32 %v2059_v30, %v2057_v29  ;;  %v527_v29 = vadd.f32 %v2055_v28, %v2053_v27 }
  0xce   :  { %v2069_v59 = vpop.f32.mrf.mxu2 }
  0xcf   :  { %v759_v17 = vpack.c.bf16 %v530_v1, %v530_v1  ;;  %v758_v34 = vpack.c.bf16 %v527_v29, %v527_v29  ;;  %724 = vmatmul.bf16.gmra.mxu1 %v1993_v46 }
  0xd1   :  { %v839_v32 = vunpack.c.l.b16 %v759_v17  ;;  %v838_v27 = vunpack.c.l.b16 %v758_v34 }
  0xd3   :  { %v482_v44 = vpop.f32.mrf.mxu0  ;;  %v844_v49 = vpack.c.b16 %v838_v27, %v837_v53 }
  0xd4   :  { %v531_v45 = vpop.f32.mrf.mxu1 }
  0xd5   :  { %v532_v55 = vadd.f32 %v531_v45, %v482_v44 }
  0xd7   :  { %v760_v13 = vpack.c.bf16 %v532_v55, %v532_v55 }
  0xd9   :  { %v840_v30 = vunpack.c.l.b16 %v760_v13 }
  0xdb   :  { %v485_v3 = vpop.f32.mrf.mxu0  ;;  %v845_v36 = vpack.c.b16 %v840_v30, %v839_v32  ;;  %675 = vmatmul.bf16.gmra.mxu0 %v1991_v42 }
  0xdc   :  { %v534_v6 = vpop.f32.mrf.mxu1 }
  0xdd   :  { %v535_v33 = vadd.f32 %v534_v6, %v485_v3  ;;  %v2073_v6 = vpop.f32.mrf.mxu3 }
  0xde   :  { %v623_v12 = vadd.f32 %v2073_v6, %v2069_v59 }
  0xdf   :  { %v761_v43 = vpack.c.bf16 %v535_v33, %v535_v33  ;;  %v575_v33 = vpop.f32.mrf.mxu2  ;;  %729 = vmatmul.bf16.gmra.mxu1 %v2001_v57 }
  0xe1   :  { %v841_v2 = vunpack.c.l.b16 %v761_v43 }
  0xe3   :  { %v487_v37 = vpop.f32.mrf.mxu0 }
  0xe4   :  { %v536_v38 = vpop.f32.mrf.mxu1 }
  0xe5   :  { %v537_v48 = vadd.f32 %v536_v38, %v487_v37  ;;  %v624_v37 = vpop.f32.mrf.mxu3 }
  0xe6   :  { %v625_v15 = vadd.f32 %v624_v37, %v575_v33 }
  0xe7   :  { %v762_v58 = vpack.c.bf16 %v537_v48, %v537_v48  ;;  %v578_v55 = vpop.f32.mrf.mxu2 }
  0xe8   :  { %v774_v17 = vpack.c.bf16 %v625_v15, %v625_v15 }
  0xe9   :  { %v842_v3 = vunpack.c.l.b16 %v762_v58  ;;  %v618_v58 = vadd.f32 %v2063_v51, %v2061_v47 }
  0xea   :  { %v814_v31 = vunpack.c.l.b16 %v774_v17 }
  0xeb   :  { %v490_v44 = vpop.f32.mrf.mxu0  ;;  %v846_v45 = vpack.c.b16 %v842_v3, %v841_v2  ;;  %v771_v1 = vpack.c.bf16 %v618_v58, %v618_v58  ;;  %v772_v2 = vpack.c.bf16 %v620_v60, %v620_v60  ;;  %680 = vmatmul.bf16.gmra.mxu0 %v1999_v56 }
  0xec   :  { %v539_v14 = vpop.f32.mrf.mxu1 }
  0xed   :  { %v540_v21 = vadd.f32 %v539_v14, %v490_v44  ;;  %855 = vmatpush.bf16.xpose.msrb.mxu2 %v846_v45  ;;  %v627_v24 = vpop.f32.mrf.mxu3  ;;  %v811_v22 = vunpack.c.l.b16 %v771_v1  ;;  %v812_v9 = vunpack.c.l.b16 %v772_v2  ;;  %v773_v14 = vpack.c.bf16 %v623_v12, %v623_v12 }
  0xee   :  { %v628_v59 = vadd.f32 %v627_v24, %v578_v55 }
  0xef   :  { %v763_v40 = vpack.c.bf16 %v540_v21, %v540_v21  ;;  %v580_v13 = vpop.f32.mrf.mxu2  ;;  %v819_v47 = vpack.c.b16 %v812_v9, %v811_v22  ;;  %v813_v30 = vunpack.c.l.b16 %v773_v14  ;;  %734 = vmatmul.bf16.gmra.mxu1 %v2009_v63 }
  0xf0   :  { %v775_v46 = vpack.c.bf16 %v628_v59, %v628_v59 }
  0xf1   :  { %v2083_v43 = vunpack.c.l.b16 %v763_v40  ;;  %v820_v32 = vpack.c.b16 %v814_v31, %v813_v30 }
  0xf3   :  { %v492_v35 = vpop.f32.mrf.mxu0 }
  0xf4   :  { %v541_v38 = vpop.f32.mrf.mxu1 }
  0xf5   :  { %v542_v41 = vadd.f32 %v541_v38, %v492_v35  ;;  %856 = vmatpush.bf16.xpose.msrb.mxu2 %v845_v36  ;;  %v629_v44 = vpop.f32.mrf.mxu3 }
  0xf6   :  { %v630_v6 = vadd.f32 %v629_v44, %v580_v13 }
  0xf7   :  { %v764_v28 = vpack.c.bf16 %v542_v41, %v542_v41  ;;  %v583_v16 = vpop.f32.mrf.mxu2 }
  0xf8   :  { %v776_v33 = vpack.c.bf16 %v630_v6, %v630_v6 }
  0xf9   :  { %v2085_v25 = vunpack.c.l.b16 %v764_v28  ;;  %v815_v28 = vunpack.c.l.b16 %v775_v46 }
  0xfa   :  { %v816_v53 = vunpack.c.l.b16 %v776_v33 }
  0xfb   :  { %v2087_v48 = vpop.f32.mrf.mxu0  ;;  %v920_v50 = vpack.c.b16 %v2085_v25, %v2083_v43  ;;  %685 = vmatmul.bf16.gmra.mxu0 %v2007_v62 }
  0xfc   :  { %v2091_v54 = vpop.f32.mrf.mxu1  ;;  %v821_v58 = vpack.c.b16 %v816_v53, %v815_v28 }
  0xfd   :  { %857 = vmatpush.bf16.xpose.msrb.mxu2 %v844_v49  ;;  %v632_v20 = vpop.f32.mrf.mxu3  ;;  %v545_v9 = vadd.f32 %v2091_v54, %v2087_v48 }
  0xfe   :  { %v633_v61 = vadd.f32 %v632_v20, %v583_v16 }
  0xff   :  { %v585_v34 = vpop.f32.mrf.mxu2  ;;  %v765_v12 = vpack.c.bf16 %v545_v9, %v545_v9  ;;  %739 = vmatmul.bf16.gmra.mxu1 %v2017_v5 }
 0x100   :  { %v777_v44 = vpack.c.bf16 %v633_v61, %v633_v61 }
 0x101   :  { %v914_v62 = vunpack.c.l.b16 %v765_v12 }
 0x102   :  { %v817_v15 = vunpack.c.l.b16 %v777_v44 }
 0x103   :  { %v497_v3 = vpop.f32.mrf.mxu0 }
 0x104   :  { %v546_v8 = vpop.f32.mrf.mxu1 }
 0x105   :  { %858 = vmatpush.bf16.xpose.msrb.mxu2 %v843_v7  ;;  %v634_v36 = vpop.f32.mrf.mxu3  ;;  %v547_v2 = vadd.f32 %v546_v8, %v497_v3 }
 0x106   :  { %v635_v0 = vadd.f32 %v634_v36, %v585_v34 }
 0x107   :  { %v588_v40 = vpop.f32.mrf.mxu2 }
 0x10b   :  { %v500_v51 = vpop.f32.mrf.mxu0  ;;  %690 = vmatmul.bf16.gmra.mxu0 %v2015_v4 }
 0x10c   :  { %v549_v45 = vpop.f32.mrf.mxu1  ;;  %859 = vmatmul.bf16.vlgmr.msrb.gmra.mxu2 %v819_v47  ;;  %v778_v47 = vpack.c.bf16 %v635_v0, %v635_v0 }
 0x10d   :  { %v637_v27 = vpop.f32.mrf.mxu3  ;;  %v550_v23 = vadd.f32 %v549_v45, %v500_v51  ;;  %v766_v51 = vpack.c.bf16 %v547_v2, %v547_v2  ;;  %v957_v2 = vlaneseq }
 0x10e   :  { %v818_v16 = vunpack.c.l.b16 %v778_v47  ;;  %v638_v63 = vadd.f32 %v637_v27, %v588_v40 }
 0x10f   :  { %v767_v57 = vpack.c.bf16 %v550_v23, %v550_v23  ;;  %v590_v1 = vpop.f32.mrf.mxu2  ;;  %v915_v20 = vunpack.c.l.b16 %v766_v51  ;;  %744 = vmatmul.bf16.gmra.mxu1 %v2025_v11 }
 0x110   :  { %v822_v8 = vpack.c.b16 %v818_v16, %v817_v15  ;;  %v779_v48 = vpack.c.bf16 %v638_v63, %v638_v63 }
 0x111   :  { %v916_v13 = vunpack.c.l.b16 %v767_v57  ;;  %v921_v17 = vpack.c.b16 %v915_v20, %v914_v62 }
 0x112   :  { %v888_v31 = vunpack.c.l.b16 %v779_v48 }
 0x113   :  { %v502_v21 = vpop.f32.mrf.mxu0 }
 0x114   :  { %v551_v29 = vpop.f32.mrf.mxu1 }
 0x115   :  { %v552_v26 = vadd.f32 %v551_v29, %v502_v21  ;;  %v639_v22 = vpop.f32.mrf.mxu3 }
 0x116   :  { %v640_v21 = vadd.f32 %v639_v22, %v590_v1  ;;  %v2122_v22 = vand.u32 127, %v957_v2 }
 0x117   :  { %v768_v56 = vpack.c.bf16 %v552_v26, %v552_v26  ;;  %v593_v14 = vpop.f32.mrf.mxu2 }
 0x118   :  { %v780_v54 = vpack.c.bf16 %v640_v21, %v640_v21 }
 0x119   :  { %v917_v7 = vunpack.c.l.b16 %v768_v56 }
 0x11b   :  { %v505_v35 = vpop.f32.mrf.mxu0  ;;  %v922_v45 = vpack.c.b16 %v917_v7, %v916_v13  ;;  %695 = vmatmul.bf16.gmra.mxu0 %v2023_v10  ;;  %v2120_v7 = vshrl.u32 %v957_v2, 7 }
 0x11c   :  { %v554_v38 = vpop.f32.mrf.mxu1  ;;  %864 = vmatmul.bf16.gmra.mxu2 %v820_v32  ;;  %v889_v32 = vunpack.c.l.b16 %v780_v54 }
 0x11d   :  { %v555_v42 = vadd.f32 %v554_v38, %v505_v35  ;;  %v642_v3 = vpop.f32.mrf.mxu3  ;;  %vm968_vm0 = vcmp.le.s32.totalorder %v2122_v22, %v2120_v7  ;;  %v2139_v20 = vadd.s32 40, %v2120_v7  ;;  %v2156_v21 = vadd.s32 48, %v2120_v7 }
 0x11e   :  { %v896_v34 = vpack.c.b16 %v889_v32, %v888_v31  ;;  %v643_v38 = vadd.f32 %v642_v3, %v593_v14 }
 0x11f   :  { %v769_v41 = vpack.c.bf16 %v555_v42, %v555_v42  ;;  %v595_v29 = vpop.f32.mrf.mxu2  ;;  %749 = vmatmul.bf16.gmra.mxu1 %v2033_v19  ;;  %vm973_vm3 = vcmp.le.s32.totalorder %v2122_v22, %v2139_v20  ;;  %vm974_vm5 = vcmp.le.s32.totalorder %v2122_v22, %v2156_v21 }
 0x120   :  { %v781_v4 = vpack.c.bf16 %v643_v38, %v643_v38 }
 0x121   :  { %v918_v55 = vunpack.c.l.b16 %v769_v41 }
 0x122   :  { %v890_v6 = vunpack.c.l.b16 %v781_v4 }
 0x123   :  { %v507_v37 = vpop.f32.mrf.mxu0 }
 0x124   :  { %v556_v39 = vpop.f32.mrf.mxu1 }
 0x125   :  { %v557_v52 = vadd.f32 %v556_v39, %v507_v37  ;;  %v644_v30 = vpop.f32.mrf.mxu3 }
 0x126   :  { %v645_v59 = vadd.f32 %v644_v30, %v595_v29  ;;  %v2168_v30 = vadd.s32 24, %v2120_v7 }
 0x127   :  { %v770_v49 = vpack.c.bf16 %v557_v52, %v557_v52  ;;  %v598_v35 = vpop.f32.mrf.mxu2 }
 0x128   :  { %v782_v5 = vpack.c.bf16 %v645_v59, %v645_v59  ;;  %vm971_vm6 = vcmp.le.s32.totalorder %v2122_v22, %v2168_v30 }
 0x129   :  { %v919_v24 = vunpack.c.l.b16 %v770_v49 }
 0x12a   :  { %v891_v42 = vunpack.c.l.b16 %v782_v5 }
 0x12b   :  { %v923_v60 = vpack.c.b16 %v919_v24, %v918_v55  ;;  %700 = vmatmul.bf16.gmra.mxu0 %v2031_v18 }
 0x12c   :  { %869 = vmatmul.bf16.gmra.mxu2 %v821_v58  ;;  %v897_v43 = vpack.c.b16 %v891_v42, %v890_v6  ;;  %v715_v26 = vpop.f32.mrf.mxu1 }
 0x12d   :  { %932 = vmatpush.bf16.xpose.msrb.mxu3 %v923_v60  ;;  %v647_v36 = vpop.f32.mrf.mxu3 }
 0x12e   :  { %v648_v25 = vadd.f32 %v647_v36, %v598_v35  ;;  %v2173_v36 = vadd.s32 56, %v2120_v7 }
 0x12f   :  { %v600_v46 = vpop.f32.mrf.mxu2 }
 0x130   :  { %v783_v40 = vpack.c.bf16 %v648_v25, %v648_v25  ;;  %vm975_vm7 = vcmp.le.s32.totalorder %v2122_v22, %v2173_v36  ;;  %v2185_v25 = vadd.s32 32, %v2120_v7 }
 0x132   :  { %v892_v41 = vunpack.c.l.b16 %v783_v40  ;;  %vm972_vm8 = vcmp.le.s32.totalorder %v2122_v22, %v2185_v25 }
 0x134   :  { %v717_v18 = vpop.f32.mrf.mxu1 }
 0x135   :  { %933 = vmatpush.bf16.xpose.msrb.mxu3 %v922_v45  ;;  %v649_v33 = vpop.f32.mrf.mxu3  ;;  %v2134_v45 = vadd.s32 8, %v2120_v7 }
 0x137   :  { %v603_v37 = vpop.f32.mrf.mxu2  ;;  %vm969_vm2 = vcmp.le.s32.totalorder %v2122_v22, %v2134_v45 }
 0x138   :  { %v666_v53 = vpop.f32.mrf.mxu0 }
 0x139   :  { %v716_v12 = vadd.f32 %v715_v26, %v666_v53 }
 0x13b   :  { %v787_v26 = vpack.c.bf16 %v716_v12, %v716_v12 }
 0x13c   :  { %874 = vmatmul.bf16.gmra.mxu2 %v822_v8  ;;  %v720_v61 = vpop.f32.mrf.mxu1  ;;  %v2151_v8 = vadd.s32 16, %v2120_v7 }
 0x13d   :  { %934 = vmatpush.bf16.xpose.msrb.mxu3 %v921_v17  ;;  %v652_v39 = vpop.f32.mrf.mxu3 }
 0x13e   :  { %v653_v49 = vadd.f32 %v652_v39, %v603_v37  ;;  %vm970_vm4 = vcmp.le.s32.totalorder %v2122_v22, %v2151_v8 }
 0x13f   :  { %v605_v27 = vpop.f32.mrf.mxu2 }
 0x140   :  { %v785_v55 = vpack.c.bf16 %v653_v49, %v653_v49  ;;  %v668_v58 = vpop.f32.mrf.mxu0 }
 0x142   :  { %v894_v56 = vunpack.c.l.b16 %v785_v55 }
 0x144   :  { %v722_v1 = vpop.f32.mrf.mxu1 }
 0x145   :  { %935 = vmatpush.bf16.xpose.msrb.mxu3 %v920_v50  ;;  %v650_v50 = vadd.f32 %v649_v33, %v600_v46  ;;  %v654_v28 = vpop.f32.mrf.mxu3 }
 0x146   :  { %v655_v23 = vadd.f32 %v654_v28, %v605_v27 }
 0x147   :  { %v784_v10 = vpack.c.bf16 %v650_v50, %v650_v50  ;;  %v718_v50 = vadd.f32 %v717_v18, %v668_v58 }
 0x148   :  { %v786_v24 = vpack.c.bf16 %v655_v23, %v655_v23  ;;  %v671_v57 = vpop.f32.mrf.mxu0 }
 0x149   :  { %v893_v11 = vunpack.c.l.b16 %v784_v10  ;;  %v721_v38 = vadd.f32 %v720_v61, %v671_v57  ;;  %v788_v49 = vpack.c.bf16 %v718_v50, %v718_v50 }
 0x14a   :  { %v895_v19 = vunpack.c.l.b16 %v786_v24 }
 0x14b   :  { %v898_v52 = vpack.c.b16 %v893_v11, %v892_v41  ;;  %v789_v39 = vpack.c.bf16 %v721_v38, %v721_v38  ;;  %v1198_v57 = vunpack.c.l.b16 %v788_v49 }
 0x14c   :  { %936 = vmatmul.bf16.vlgmr.msrb.gmra.mxu3 %v896_v34  ;;  %v899_v60 = vpack.c.b16 %v895_v19, %v894_v56  ;;  %v725_v13 = vpop.f32.mrf.mxu1 }
 0x14d   :  { %v1199_v23 = vunpack.c.l.b16 %v789_v39 }
 0x150   :  { %v673_v0 = vpop.f32.mrf.mxu0 }
 0x154   :  { %v727_v16 = vpop.f32.mrf.mxu1 }
 0x158   :  { %v676_v9 = vpop.f32.mrf.mxu0 }
 0x159   :  { %v726_v42 = vadd.f32 %v725_v13, %v676_v9 }
 0x15b   :  { %v791_v40 = vpack.c.bf16 %v726_v42, %v726_v42 }
 0x15c   :  { %941 = vmatmul.bf16.gmra.mxu3 %v897_v43  ;;  %v730_v63 = vpop.f32.mrf.mxu1 }
 0x15d   :  { %v1201_v27 = vunpack.c.l.b16 %v791_v40 }
 0x160   :  { %v678_v15 = vpop.f32.mrf.mxu0 }
 0x161   :  { %v728_v46 = vadd.f32 %v727_v16, %v678_v15 }
 0x163   :  { %v792_v10 = vpack.c.bf16 %v728_v46, %v728_v46 }
 0x164   :  { %v732_v34 = vpop.f32.mrf.mxu1 }
 0x165   :  { %v1202_v28 = vunpack.c.l.b16 %v792_v10 }
 0x167   :  { %v1207_v24 = vpack.c.b16 %v1202_v28, %v1201_v27 }
 0x168   :  { %v681_v17 = vpop.f32.mrf.mxu0 }
 0x169   :  { %v731_v32 = vadd.f32 %v730_v63, %v681_v17 }
 0x16b   :  { %v793_v59 = vpack.c.bf16 %v731_v32, %v731_v32 }
 0x16c   :  { %946 = vmatmul.bf16.gmra.mxu3 %v898_v52  ;;  %v723_v52 = vadd.f32 %v722_v1, %v673_v0  ;;  %v735_v53 = vpop.f32.mrf.mxu1 }
 0x16d   :  { %v1203_v33 = vunpack.c.l.b16 %v793_v59 }
 0x16e   :  { %v790_v55 = vpack.c.bf16 %v723_v52, %v723_v52 }
 0x170   :  { %v683_v31 = vpop.f32.mrf.mxu0  ;;  %v1200_v56 = vunpack.c.l.b16 %v790_v55 }
 0x171   :  { %v733_v35 = vadd.f32 %v732_v34, %v683_v31 }
 0x172   :  { %v1206_v61 = vpack.c.b16 %v1200_v56, %v1199_v23 }
 0x173   :  { %v794_v5 = vpack.c.bf16 %v733_v35, %v733_v35 }
 0x174   :  { %v737_v1 = vpop.f32.mrf.mxu1 }
 0x175   :  { %v1204_v37 = vunpack.c.l.b16 %v794_v5 }
 0x177   :  { %v1208_v41 = vpack.c.b16 %v1204_v37, %v1203_v33 }
 0x178   :  { %v686_v11 = vpop.f32.mrf.mxu0 }
 0x179   :  { %1229 = vmatpush.bf16.msra.mxu2 %v1208_v41  ;;  %v736_v32 = vadd.f32 %v735_v53, %v686_v11 }
 0x17c   :  { %951 = vmatmul.bf16.gmra.mxu3 %v899_v60  ;;  %v1197_v60 = vunpack.c.l.b16 %v787_v26  ;;  %v740_v13 = vpop.f32.mrf.mxu1 }
 0x17d   :  { %1230 = vmatpush.bf16.msra.mxu2 %v1207_v24 }
 0x17e   :  { %v1205_v2 = vpack.c.b16 %v1198_v57, %v1197_v60 }
 0x180   :  { %v688_v0 = vpop.f32.mrf.mxu0 }
 0x181   :  { %1231 = vmatpush.bf16.msra.mxu2 %v1206_v61  ;;  %v738_v52 = vadd.f32 %v737_v1, %v688_v0 }
 0x183   :  { %v796_v56 = vpack.c.bf16 %v738_v52, %v738_v52 }
 0x185   :  { %1232 = vmatpush.bf16.msra.mxu2 %v1205_v2 }
 0x188   :  { %v691_v9 = vpop.f32.mrf.mxu0 }
 0x189   :  { %v741_v30 = vadd.f32 %v740_v13, %v691_v9 }
 0x18b   :  { %v797_v60 = vpack.c.bf16 %v741_v30, %v741_v30 }
 0x18d   :  { %v1284_v2 = vunpack.c.l.b16 %v797_v60 }
 0x18f   :  { %v860_v44 = vpop.f32.mrf.mxu2 }
 0x190   :  { %v2129_v47 = vsel %vm968_vm0, %v860_v44, -1e+30  ;;  %v693_v44 = vpop.f32.mrf.mxu0 }
 0x191   :  { %v1009_v51 = vsel %vm1008_vm1, %v2129_v47, -inf }
 0x192   :  { %1010 = vmax.xlane.f32.xlu0 %v1009_v51  ;;  %v742_v51 = vpop.f32.mrf.mxu1 }
 0x193   :  { %v743_v23 = vadd.f32 %v742_v51, %v693_v44 }
 0x195   :  { %v798_v57 = vpack.c.bf16 %v743_v23, %v743_v23 }
 0x197   :  { %v862_v14 = vpop.f32.mrf.mxu2  ;;  %v1285_v9 = vunpack.c.l.b16 %v798_v57 }
 0x198   :  { %v2146_v62 = vsel %vm969_vm2, %v862_v14, -1e+30  ;;  %v696_v12 = vpop.f32.mrf.mxu0 }
 0x199   :  { %v1012_v3 = vsel %vm1008_vm1, %v2146_v62, -inf }
 0x19a   :  { %1013 = vmax.xlane.f32.xlu0 %v1012_v3  ;;  %v745_v15 = vpop.f32.mrf.mxu1 }
 0x19b   :  { %v746_v40 = vadd.f32 %v745_v15, %v696_v12  ;;  %v1283_v12 = vunpack.c.l.b16 %v796_v56  ;;  %v1291_v15 = vpack.c.b16 %v1285_v9, %v1284_v2 }
 0x19d   :  { %v799_v53 = vpack.c.bf16 %v746_v40, %v746_v40 }
 0x19f   :  { %v865_v48 = vpop.f32.mrf.mxu2  ;;  %v1286_v55 = vunpack.c.l.b16 %v799_v53 }
 0x1a0   :  { %v2163_v54 = vsel %vm970_vm4, %v865_v48, -1e+30  ;;  %v698_v17 = vpop.f32.mrf.mxu0 }
 0x1a1   :  { %v1015_v29 = vsel %vm1008_vm1, %v2163_v54, -inf }
 0x1a2   :  { %1016 = vmax.xlane.f32.xlu2 %v1015_v29  ;;  %v747_v63 = vpop.f32.mrf.mxu1 }
 0x1a3   :  { %v748_v10 = vadd.f32 %v747_v63, %v698_v17 }
 0x1a5   :  { %v800_v26 = vpack.c.bf16 %v748_v10, %v748_v10 }
 0x1a7   :  { %v867_v4 = vpop.f32.mrf.mxu2  ;;  %v1287_v24 = vunpack.c.l.b16 %v800_v26 }
 0x1a8   :  { %v2180_v6 = vsel %vm971_vm6, %v867_v4, -1e+30  ;;  %v701_v7 = vpop.f32.mrf.mxu0 }
 0x1a9   :  { %v1018_v43 = vsel %vm1008_vm1, %v2180_v6, -inf  ;;  %v1292_v61 = vpack.c.b16 %v1287_v24, %v1286_v55 }
 0x1aa   :  { %1019 = vmax.xlane.f32.xlu2 %v1018_v43  ;;  %v750_v34 = vpop.f32.mrf.mxu1 }
 0x1ab   :  { %v751_v5 = vadd.f32 %v750_v34, %v701_v7 }
 0x1ad   :  { %v801_v43 = vpack.c.bf16 %v751_v5, %v751_v5 }
 0x1af   :  { %v870_v58 = vpop.f32.mrf.mxu2  ;;  %v1288_v27 = vunpack.c.l.b16 %v801_v43 }
 0x1b0   :  { %v2192_v18 = vsel %vm972_vm8, %v870_v58, -1e+30  ;;  %v703_v45 = vpop.f32.mrf.mxu0  ;;  %v795_v58 = vpack.c.bf16 %v736_v32, %v736_v32 }
 0x1b1   :  { %v1021_v19 = vsel %vm1008_vm1, %v2192_v18, -inf }
 0x1b2   :  { %1022 = vmax.xlane.f32.xlu2 %v1021_v19  ;;  %v752_v42 = vpop.f32.mrf.mxu1  ;;  %v1282_v51 = vunpack.c.l.b16 %v795_v58 }
 0x1b3   :  { %v753_v33 = vadd.f32 %v752_v42, %v703_v45 }
 0x1b5   :  { %v802_v37 = vpack.c.bf16 %v753_v33, %v753_v33 }
 0x1b7   :  { %v872_v38 = vpop.f32.mrf.mxu2  ;;  %v1289_v28 = vunpack.c.l.b16 %v802_v37 }
 0x1b8   :  { %v2220_v46 = vsel %vm973_vm3, %v872_v38, -1e+30 }
 0x1b9   :  { %v1024_v39 = vsel %vm1008_vm1, %v2220_v46, -inf  ;;  %v1293_v49 = vpack.c.b16 %v1289_v28, %v1288_v27 }
 0x1bb   :  { %1314 = vmatpush.bf16.msra.mxu3 %v1293_v49 }
 0x1bf   :  { %v875_v11 = vpop.f32.mrf.mxu2  ;;  %1315 = vmatpush.bf16.msra.mxu3 %v1292_v61 }
 0x1c0   :  { %v2234_v19 = vsel %vm974_vm5, %v875_v11, -1e+30 }
 0x1c1   :  { %v1027_v44 = vsel %vm1008_vm1, %v2234_v19, -inf }
 0x1c3   :  { %1316 = vmatpush.bf16.msra.mxu3 %v1291_v15 }
 0x1cf   :  { %v937_v16 = vpop.f32.mrf.mxu3 }
 0x1d0   :  { %v2199_v14 = vsel %vm968_vm0, %v937_v16, -1e+30  ;;  %v877_v16 = vpop.f32.mrf.mxu2 }
 0x1d1   :  { %v1033_v3 = vsel %vm1008_vm1, %v2199_v14, -inf  ;;  %v2248_v25 = vsel %vm975_vm7, %v877_v16, -1e+30 }
 0x1d2   :  { %1034 = vmax.xlane.f32.xlu1 %v1033_v3  ;;  %v1290_v3 = vpack.c.b16 %v1283_v12, %v1282_v51 }
 0x1d4   :  { %1317 = vmatpush.bf16.msra.mxu3 %v1290_v3 }
 0x1d7   :  { %v939_v48 = vpop.f32.mrf.mxu3 }
 0x1d8   :  { %v2206_v29 = vsel %vm969_vm2, %v939_v48, -1e+30 }
 0x1d9   :  { %v1036_v31 = vsel %vm1008_vm1, %v2206_v29, -inf }
 0x1da   :  { %1037 = vmax.xlane.f32.xlu1 %v1036_v31  ;;  %v1030_v31 = vsel %vm1008_vm1, %v2248_v25, -inf }
 0x1df   :  { %v942_v35 = vpop.f32.mrf.mxu3 }
 0x1e0   :  { %v2213_v59 = vsel %vm970_vm4, %v942_v35, -1e+30 }
 0x1e1   :  { %v1039_v4 = vsel %vm1008_vm1, %v2213_v59, -inf }
 0x1e2   :  { %1040 = vmax.xlane.f32.xlu0 %v1039_v4 }
 0x1e7   :  { %v944_v50 = vpop.f32.mrf.mxu3 }
 0x1e8   :  { %v2225_v8 = vsel %vm971_vm6, %v944_v50, -1e+30 }
 0x1e9   :  { %v1042_v41 = vsel %vm1008_vm1, %v2225_v8, -inf }
 0x1ea   :  { %1043 = vmax.xlane.f32.xlu1 %v1042_v41  ;;  %1025 = vmax.xlane.f32.xlu0 %v1024_v39 }
 0x1ef   :  { %v947_v0 = vpop.f32.mrf.mxu3 }
 0x1f0   :  { %v2239_v1 = vsel %vm972_vm8, %v947_v0, -1e+30 }
 0x1f1   :  { %v1045_v13 = vsel %vm1008_vm1, %v2239_v1, -inf }
 0x1f2   :  { %1046 = vmax.xlane.f32.xlu1 %v1045_v13  ;;  %1028 = vmax.xlane.f32.xlu0 %v1027_v44 }
 0x1f7   :  { %v949_v17 = vpop.f32.mrf.mxu3 }
 0x1f8   :  { %v2253_v63 = vsel %vm973_vm3, %v949_v17, -1e+30 }
 0x1f9   :  { %v1048_v48 = vsel %vm1008_vm1, %v2253_v63, -inf }
 0x1fa   :  { %1049 = vmax.xlane.f32.xlu2 %v1048_v48  ;;  %1031 = vmax.xlane.f32.xlu1 %v1030_v31 }
 0x1ff   :  { %v952_v32 = vpop.f32.mrf.mxu3 }
 0x200   :  { %v2262_v7 = vsel %vm974_vm5, %v952_v32, -1e+30 }
 0x201   :  { %v1051_v20 = vsel %vm1008_vm1, %v2262_v7, -inf }
 0x202   :  { %1052 = vmax.xlane.f32.xlu2 %v1051_v20 }
 0x205   :  { %v1011_v34 = vpop.xlane.xlu0 %1010 }
 0x206   :  { %v1057_v35 = vsub.f32 %v2129_v47, %v1011_v34 }
 0x207   :  { %v954_v38 = vpop.f32.mrf.mxu3 }
 0x208   :  { %v1073_v4 = vmul.f32 1.442695, %v1057_v35  ;;  %v2270_v45 = vsel %vm975_vm7, %v954_v38, -1e+30 }
 0x209   :  { %v1054_v5 = vsel %vm1008_vm1, %v2270_v45, -inf }
 0x20a   :  { %1807 = vpow2.f32 %v1073_v4  ;;  %1055 = vmax.xlane.f32.xlu0 %v1054_v5 }
 0x20d   :  { %v1014_v21 = vpop.xlane.xlu0 %1013 }
 0x20e   :  { %v1058_v42 = vsub.f32 %v2146_v62, %v1014_v21 }
 0x210   :  { %v1808_v33 = vpop.eup %1807  ;;  %v1075_v43 = vmul.f32 1.442695, %v1058_v42 }
 0x211   :  { %v1105_v50 = vsel %vm1008_vm1, %v1808_v33, 0.0  ;;  %v1153_v22 = vpack.c.bf16 %v1808_v33, %v1808_v33 }
 0x212   :  { %1809 = vpow2.f32 %v1075_v43  ;;  %1106 = vadd.xlane.f32.xlu1 %v1105_v50 }
 0x213   :  { %v1177_v41 = vunpack.c.l.b16 %v1153_v22 }
 0x215   :  { %v1017_v47 = vpop.xlane.xlu2 %1016 }
 0x216   :  { %v1059_v37 = vsub.f32 %v2163_v54, %v1017_v47 }
 0x218   :  { %v1810_v36 = vpop.eup %1809  ;;  %v1077_v39 = vmul.f32 1.442695, %v1059_v37 }
 0x219   :  { %v1154_v40 = vpack.c.bf16 %v1810_v36, %v1810_v36  ;;  %v1108_v10 = vsel %vm1008_vm1, %v1810_v36, 0.0 }
 0x21a   :  { %1811 = vpow2.f32 %v1077_v39  ;;  %1109 = vadd.xlane.f32.xlu2 %v1108_v10 }
 0x21b   :  { %v1178_v11 = vunpack.c.l.b16 %v1154_v40 }
 0x21d   :  { %v1185_v62 = vpack.c.b16 %v1178_v11, %v1177_v41  ;;  %v1020_v52 = vpop.xlane.xlu2 %1019 }
 0x21e   :  { %v1060_v27 = vsub.f32 %v2180_v6, %v1020_v52 }
 0x21f   :  { %1679 = vmatmul.msk.bf16.vlgmr.msra.gmra.mxu2 %vm1008_vm1, %v1185_v62 }
 0x220   :  { %v1812_v28 = vpop.eup %1811  ;;  %v1079_v53 = vmul.f32 1.442695, %v1060_v27 }
 0x221   :  { %v1111_v54 = vsel %vm1008_vm1, %v1812_v28, 0.0  ;;  %v1155_v30 = vpack.c.bf16 %v1812_v28, %v1812_v28 }
 0x222   :  { %1813 = vpow2.f32 %v1079_v53  ;;  %1112 = vadd.xlane.f32.xlu0 %v1111_v54 }
 0x223   :  { %v1179_v6 = vunpack.c.l.b16 %v1155_v30 }
 0x225   :  { %v1023_v26 = vpop.xlane.xlu2 %1022 }
 0x226   :  { %v1061_v49 = vsub.f32 %v2192_v18, %v1023_v26 }
 0x228   :  { %v1814_v23 = vpop.eup %1813  ;;  %v1081_v55 = vmul.f32 1.442695, %v1061_v49 }
 0x229   :  { %v1156_v24 = vpack.c.bf16 %v1814_v23, %v1814_v23  ;;  %v1114_v58 = vsel %vm1008_vm1, %v1814_v23, 0.0 }
 0x22a   :  { %1815 = vpow2.f32 %v1081_v55  ;;  %1115 = vadd.xlane.f32.xlu1 %v1114_v58 }
 0x22b   :  { %v1180_v56 = vunpack.c.l.b16 %v1156_v24 }
 0x22d   :  { %v1186_v60 = vpack.c.b16 %v1180_v56, %v1179_v6 }
 0x22f   :  { %1680 = vmatmul.msk.bf16.gmra.mxu2 %vm1008_vm1, %v1186_v60 }
 0x230   :  { %v1816_v57 = vpop.eup %1815 }
 0x231   :  { %v1117_v61 = vsel %vm1008_vm1, %v1816_v57, 0.0  ;;  %v1157_v50 = vpack.c.bf16 %v1816_v57, %v1816_v57 }
 0x232   :  { %1118 = vadd.xlane.f32.xlu2 %v1117_v61 }
 0x233   :  { %v1181_v41 = vunpack.c.l.b16 %v1157_v50 }
 0x245   :  { %v1035_v0 = vpop.xlane.xlu1 %1034 }
 0x246   :  { %v1065_v18 = vsub.f32 %v2199_v14, %v1035_v0 }
 0x248   :  { %v1089_v2 = vmul.f32 1.442695, %v1065_v18 }
 0x24a   :  { %1817 = vpow2.f32 %v1089_v2 }
 0x24d   :  { %v1038_v9 = vpop.xlane.xlu1 %1037 }
 0x24e   :  { %v1066_v13 = vsub.f32 %v2206_v29, %v1038_v9 }
 0x250   :  { %v1091_v44 = vmul.f32 1.442695, %v1066_v13  ;;  %v1818_v51 = vpop.eup %1817 }
 0x251   :  { %v1161_v16 = vpack.c.bf16 %v1818_v51, %v1818_v51  ;;  %v1129_v49 = vsel %vm1008_vm1, %v1818_v51, 0.0 }
 0x252   :  { %1819 = vpow2.f32 %v1091_v44 }
 0x253   :  { %v1262_v31 = vunpack.c.l.b16 %v1161_v16 }
 0x255   :  { %v1041_v12 = vpop.xlane.xlu0 %1040 }
 0x256   :  { %v1067_v15 = vsub.f32 %v2213_v59, %v1041_v12 }
 0x258   :  { %v2288_v3 = vpop.eup %1819  ;;  %v1093_v48 = vmul.f32 1.442695, %v1067_v15 }
 0x259   :  { %v1162_v17 = vpack.c.bf16 %v2288_v3, %v2288_v3  ;;  %v1132_v57 = vsel %vm1008_vm1, %v2288_v3, 0.0 }
 0x25a   :  { %1821 = vpow2.f32 %v1093_v48 }
 0x25b   :  { %v1263_v14 = vunpack.c.l.b16 %v1162_v17 }
 0x25d   :  { %v1270_v32 = vpack.c.b16 %v1263_v14, %v1262_v31  ;;  %v1044_v20 = vpop.xlane.xlu1 %1043  ;;  %v1026_v34 = vpop.xlane.xlu0 %1025 }
 0x25e   :  { %v1068_v29 = vsub.f32 %v2225_v8, %v1044_v20  ;;  %v1062_v35 = vsub.f32 %v2220_v46, %v1026_v34 }
 0x25f   :  { %1683 = vmatmul.msk.bf16.vlgmr.msra.gmra.mxu3 %vm1008_vm1, %v1270_v32 }
 0x260   :  { %v1095_v59 = vmul.f32 1.442695, %v1068_v29  ;;  %v1083_v38 = vmul.f32 1.442695, %v1062_v35  ;;  %v2295_v4 = vpop.eup %1821 }
 0x261   :  { %v1163_v43 = vpack.c.bf16 %v2295_v4, %v2295_v4  ;;  %v1135_v31 = vsel %vm1008_vm1, %v2295_v4, 0.0 }
 0x262   :  { %1823 = vpow2.f32 %v1095_v59 }
 0x263   :  { %1825 = vpow2.f32 %v1083_v38  ;;  %v1264_v40 = vunpack.c.l.b16 %v1163_v43 }
 0x265   :  { %v1047_v5 = vpop.xlane.xlu1 %1046  ;;  %v1029_v21 = vpop.xlane.xlu0 %1028 }
 0x266   :  { %v1069_v42 = vsub.f32 %v2239_v1, %v1047_v5  ;;  %v1063_v33 = vsub.f32 %v2234_v19, %v1029_v21 }
 0x268   :  { %v1824_v8 = vpop.eup %1823  ;;  %v1085_v46 = vmul.f32 1.442695, %v1063_v33  ;;  %v1097_v36 = vmul.f32 1.442695, %v1069_v42 }
 0x269   :  { %v1826_v47 = vpop.eup %1825  ;;  %v1164_v37 = vpack.c.bf16 %v1824_v8, %v1824_v8  ;;  %v1138_v0 = vsel %vm1008_vm1, %v1824_v8, 0.0 }
 0x26a   :  { %v1158_v22 = vpack.c.bf16 %v1826_v47, %v1826_v47  ;;  %v1120_v39 = vsel %vm1008_vm1, %v1826_v47, 0.0  ;;  %1827 = vpow2.f32 %v1085_v46 }
 0x26b   :  { %v1265_v10 = vunpack.c.l.b16 %v1164_v37  ;;  %1121 = vadd.xlane.f32.xlu0 %v1120_v39  ;;  %1829 = vpow2.f32 %v1097_v36 }
 0x26c   :  { %v1182_v1 = vunpack.c.l.b16 %v1158_v22 }
 0x26d   :  { %v1050_v11 = vpop.xlane.xlu2 %1049  ;;  %v1032_v19 = vpop.xlane.xlu1 %1031  ;;  %v1271_v62 = vpack.c.b16 %v1265_v10, %v1264_v40 }
 0x26e   :  { %v1070_v52 = vsub.f32 %v2253_v63, %v1050_v11  ;;  %v1064_v27 = vsub.f32 %v2248_v25, %v1032_v19  ;;  %v1187_v28 = vpack.c.b16 %v1182_v1, %v1181_v41 }
 0x26f   :  { %1684 = vmatmul.msk.bf16.gmra.mxu3 %vm1008_vm1, %v1271_v62 }
 0x270   :  { %v1099_v53 = vmul.f32 1.442695, %v1070_v52  ;;  %v1087_v54 = vmul.f32 1.442695, %v1064_v27  ;;  %1681 = vmatmul.msk.bf16.gmra.mxu2 %vm1008_vm1, %v1187_v28  ;;  %v1828_v26 = vpop.eup %1827 }
 0x271   :  { %v1123_v30 = vsel %vm1008_vm1, %v1828_v26, 0.0  ;;  %v1830_v23 = vpop.eup %1829  ;;  %v1159_v58 = vpack.c.bf16 %v1828_v26, %v1828_v26 }
 0x272   :  { %1831 = vpow2.f32 %v1099_v53  ;;  %1124 = vadd.xlane.f32.xlu1 %v1123_v30  ;;  %v1165_v55 = vpack.c.bf16 %v1830_v23, %v1830_v23  ;;  %v1141_v48 = vsel %vm1008_vm1, %v1830_v23, 0.0 }
 0x273   :  { %1833 = vpow2.f32 %v1087_v54  ;;  %1130 = vadd.xlane.f32.xlu0 %v1129_v49 }
 0x274   :  { %v1266_v2 = vunpack.c.l.b16 %v1165_v55 }
 0x275   :  { %v1053_v63 = vpop.xlane.xlu2 %1052 }
 0x276   :  { %v1071_v25 = vsub.f32 %v2262_v7, %v1053_v63  ;;  %v1183_v7 = vunpack.c.l.b16 %v1159_v58 }
 0x278   :  { %v1832_v24 = vpop.eup %1831  ;;  %v1101_v6 = vmul.f32 1.442695, %v1071_v25 }
 0x279   :  { %v1834_v56 = vpop.eup %1833  ;;  %v1166_v60 = vpack.c.bf16 %v1832_v24, %v1832_v24  ;;  %v1144_v35 = vsel %vm1008_vm1, %v1832_v24, 0.0 }
 0x27a   :  { %v1160_v61 = vpack.c.bf16 %v1834_v56, %v1834_v56  ;;  %1835 = vpow2.f32 %v1101_v6  ;;  %v1126_v18 = vsel %vm1008_vm1, %v1834_v56, 0.0  ;;  %1133 = vadd.xlane.f32.xlu1 %v1132_v57 }
 0x27b   :  { %v1267_v9 = vunpack.c.l.b16 %v1166_v60  ;;  %1139 = vadd.xlane.f32.xlu0 %v1138_v0  ;;  %1127 = vadd.xlane.f32.xlu2 %v1126_v18 }
 0x27c   :  { %v1184_v13 = vunpack.c.l.b16 %v1160_v61 }
 0x27d   :  { %v1056_v44 = vpop.xlane.xlu0 %1055  ;;  %v1272_v51 = vpack.c.b16 %v1267_v9, %v1266_v2 }
 0x27e   :  { %v1072_v12 = vsub.f32 %v2270_v45, %v1056_v44  ;;  %v1188_v15 = vpack.c.b16 %v1184_v13, %v1183_v7 }
 0x27f   :  { %1685 = vmatmul.msk.bf16.gmra.mxu3 %vm1008_vm1, %v1272_v51 }
 0x280   :  { %v1836_v16 = vpop.eup %1835  ;;  %v1103_v3 = vmul.f32 1.442695, %v1072_v12  ;;  %1682 = vmatmul.msk.bf16.gmra.mxu2 %vm1008_vm1, %v1188_v15 }
 0x281   :  { %v1147_v17 = vsel %vm1008_vm1, %v1836_v16, 0.0  ;;  %v1167_v14 = vpack.c.bf16 %v1836_v16, %v1836_v16 }
 0x282   :  { %1837 = vpow2.f32 %v1103_v3  ;;  %1142 = vadd.xlane.f32.xlu1 %v1141_v48 }
 0x283   :  { %1148 = vadd.xlane.f32.xlu0 %v1147_v17  ;;  %1136 = vadd.xlane.f32.xlu2 %v1135_v31  ;;  %v1268_v34 = vunpack.c.l.b16 %v1167_v14 }
 0x285   :  { %v1107_v38 = vpop.xlane.xlu1 %1106 }
 0x286   :  { %1839 = vrcp.f32 %v1107_v38 }
 0x288   :  { %v1838_v45 = vpop.eup %1837 }
 0x289   :  { %v1168_v32 = vpack.c.bf16 %v1838_v45, %v1838_v45  ;;  %v1150_v20 = vsel %vm1008_vm1, %v1838_v45, 0.0 }
 0x28a   :  { %1151 = vadd.xlane.f32.xlu1 %v1150_v20 }
 0x28b   :  { %v1269_v29 = vunpack.c.l.b16 %v1168_v32  ;;  %1145 = vadd.xlane.f32.xlu2 %v1144_v35 }
 0x28c   :  { %v1840_v4 = vpop.eup %1839 }
 0x28d   :  { %v1273_v59 = vpack.c.b16 %v1269_v29, %v1268_v34  ;;  %v1110_v5 = vpop.xlane.xlu2 %1109 }
 0x28e   :  { %1841 = vrcp.f32 %v1110_v5 }
 0x28f   :  { %1686 = vmatmul.msk.bf16.gmra.mxu3 %vm1008_vm1, %v1273_v59 }
 0x294   :  { %v1842_v42 = vpop.eup %1841 }
 0x295   :  { %v1113_v46 = vpop.xlane.xlu0 %1112 }
 0x296   :  { %1843 = vrcp.f32 %v1113_v46 }
 0x29c   :  { %v1844_v22 = vpop.eup %1843 }
 0x29d   :  { %v1116_v47 = vpop.xlane.xlu1 %1115 }
 0x29e   :  { %1845 = vrcp.f32 %v1116_v47 }
 0x2a2   :  { %v1234_v21 = vpop.f32.mrf.mxu2 }
 0x2a3   :  { %v1355_v43 = vmul.f32 %v1840_v4, %v1234_v21 }
 0x2a4   :  { %v1846_v36 = vpop.eup %1845 }
 0x2a5   :  { %v1119_v62 = vpop.xlane.xlu2 %1118 }
 0x2aa   :  { %v1236_v33 = vpop.f32.mrf.mxu2 }
 0x2ab   :  { %v1356_v8 = vmul.f32 %v1842_v42, %v1236_v33 }
 0x2ad   :  { %v1754_v50 = vpack.c.bf16 %v1356_v8, %v1355_v43 }
 0x2af   :  { %1755 = vst [vmem:[#allocation7] sm:$0xff] %v1754_v50  }
 0x2b2   :  { %v1239_v37 = vpop.f32.mrf.mxu2 }
 0x2b3   :  { %v1357_v40 = vmul.f32 %v1844_v22, %v1239_v37 }
 0x2ba   :  { %v1241_v39 = vpop.f32.mrf.mxu2 }
 0x2bb   :  { %v1358_v10 = vmul.f32 %v1846_v36, %v1241_v39 }
 0x2bd   :  { %v1759_v41 = vpack.c.bf16 %v1358_v10, %v1357_v40 }
 0x2bf   :  { %1791 = vst [vmem:[#allocation7 + $0x8] sm:$0xff] %v1759_v41  }
 0x2de   :  { %v1122_v1 = vpop.xlane.xlu0 %1121 }
 0x2e2   :  { %v1319_v11 = vpop.f32.mrf.mxu3 }
 0x2e5   :  { %v1125_v19 = vpop.xlane.xlu1 %1124 }
 0x2e6   :  { %v1131_v52 = vpop.xlane.xlu0 %1130 }
 0x2e7   :  { %1847 = vrcp.f32 %v1131_v52 }
 0x2ea   :  { %v1321_v27 = vpop.f32.mrf.mxu3 }
 0x2ed   :  { %v1134_v28 = vpop.xlane.xlu1 %1133  ;;  %v1848_v30 = vpop.eup %1847 }
 0x2ee   :  { %v1128_v53 = vpop.xlane.xlu2 %1127  ;;  %1849 = vrcp.f32 %v1134_v28  ;;  %v1140_v49 = vpop.xlane.xlu0 %1139  ;;  %v1363_v25 = vmul.f32 %v1848_v30, %v1319_v11 }
 0x2ef   :  { %1851 = vrcp.f32 %v1119_v62 }
 0x2f0   :  { %1853 = vrcp.f32 %v1122_v1 }
 0x2f1   :  { %1855 = vrcp.f32 %v1140_v49 }
 0x2f2   :  { %v1324_v54 = vpop.f32.mrf.mxu3 }
 0x2f3   :  { %v1244_v26 = vpop.f32.mrf.mxu2 }
 0x2f4   :  { %v1850_v23 = vpop.eup %1849 }
 0x2f5   :  { %v1364_v55 = vmul.f32 %v1850_v23, %v1321_v27  ;;  %v1852_v24 = vpop.eup %1851  ;;  %v1143_v13 = vpop.xlane.xlu1 %1142 }
 0x2f6   :  { %v1137_v63 = vpop.xlane.xlu2 %1136  ;;  %v1854_v56 = vpop.eup %1853  ;;  %v1359_v57 = vmul.f32 %v1852_v24, %v1244_v26 }
 0x2f7   :  { %1857 = vrcp.f32 %v1137_v63  ;;  %v1774_v58 = vpack.c.bf16 %v1364_v55, %v1363_v25  ;;  %v1856_v0 = vpop.eup %1855  ;;  %v1149_v59 = vpop.xlane.xlu0 %1148 }
 0x2f8   :  { %1859 = vrcp.f32 %v1125_v19 }
 0x2f9   :  { %1794 = vst [vmem:[#allocation7 + $0x20] sm:$0xff] %v1774_v58   ;;  %1861 = vrcp.f32 %v1143_v13 }
 0x2fa   :  { %v1326_v6 = vpop.f32.mrf.mxu3 }
 0x2fb   :  { %v1246_v60 = vpop.f32.mrf.mxu2  ;;  %v1366_v7 = vmul.f32 %v1856_v0, %v1326_v6 }
 0x2fc   :  { %v1360_v61 = vmul.f32 %v1854_v56, %v1246_v60 }
 0x2fd   :  { %v1858_v18 = vpop.eup %1857  ;;  %v1152_v38 = vpop.xlane.xlu1 %1151 }
 0x2fe   :  { %v1764_v2 = vpack.c.bf16 %v1360_v61, %v1359_v57  ;;  %v1365_v9 = vmul.f32 %v1858_v18, %v1324_v54  ;;  %v1146_v51 = vpop.xlane.xlu2 %1145  ;;  %v1860_v16 = vpop.eup %1859 }
 0x2ff   :  { %1863 = vrcp.f32 %v1146_v51  ;;  %v1862_v3 = vpop.eup %1861 }
 0x300   :  { %1792 = vst [vmem:[#allocation7 + $0x10] sm:$0xff] %v1764_v2   ;;  %v1779_v44 = vpack.c.bf16 %v1366_v7, %v1365_v9  ;;  %1865 = vrcp.f32 %v1128_v53 }
 0x301   :  { %1867 = vrcp.f32 %v1149_v59 }
 0x302   :  { %v1329_v12 = vpop.f32.mrf.mxu3  ;;  %1795 = vst [vmem:[#allocation7 + $0x28] sm:$0xff] %v1779_v44   ;;  %1869 = vrcp.f32 %v1152_v38 }
 0x303   :  { %v1249_v15 = vpop.f32.mrf.mxu2  ;;  %v1367_v14 = vmul.f32 %v1862_v3, %v1329_v12 }
 0x304   :  { %v1361_v20 = vmul.f32 %v1860_v16, %v1249_v15 }
 0x305   :  { %v1864_v17 = vpop.eup %1863 }
 0x306   :  { %v1866_v31 = vpop.eup %1865 }
 0x307   :  { %v1868_v21 = vpop.eup %1867 }
 0x308   :  { %v1870_v4 = vpop.eup %1869 }
 0x30a   :  { %v1331_v48 = vpop.f32.mrf.mxu3 }
 0x30b   :  { %v1251_v45 = vpop.f32.mrf.mxu2  ;;  %v1368_v32 = vmul.f32 %v1864_v17, %v1331_v48 }
 0x30c   :  { %v1362_v34 = vmul.f32 %v1866_v31, %v1251_v45 }
 0x30d   :  { %v1784_v29 = vpack.c.bf16 %v1368_v32, %v1367_v14 }
 0x30e   :  { %v1769_v35 = vpack.c.bf16 %v1362_v34, %v1361_v20 }
 0x30f   :  { %1796 = vst [vmem:[#allocation7 + $0x30] sm:$0xff] %v1784_v29  }
 0x310   :  { %1793 = vst [vmem:[#allocation7 + $0x18] sm:$0xff] %v1769_v35  }
 0x312   :  { %v1334_v5 = vpop.f32.mrf.mxu3 }
 0x313   :  { %v1369_v33 = vmul.f32 %v1868_v21, %v1334_v5 }
 0x31a   :  { %v1336_v42 = vpop.f32.mrf.mxu3 }
 0x31b   :  { %v1370_v43 = vmul.f32 %v1870_v4, %v1336_v42 }
 0x31d   :  { %v1789_v8 = vpack.c.bf16 %v1370_v43, %v1369_v33 }
 0x31f   :  { %1797 = vst [vmem:[#allocation7 + $0x38] sm:$0xff] %v1789_v8  }
 0x320   :  { %1415 = dma.vmem_to_hbm [thread:$0]  %s1408_s1, 1024, %s1410_s25, [#allocation4], %s1956_s26, %s1956_s26, %s1957_s27  }
 0x321   :  { %1947 = dma.done.wait [#allocation4], 1024  }
 0x322   :  { %1948 = vsyncadd [#allocation4], 4294966272 }
 0x323   :  { %1420 = vsyncpa [#allocation3], 1 }
 0x324   :  { %1421 = vsyncpa [#allocation6], 1 }
 0x325   :  { %1422 = vsyncpa [#allocation4], 1 }

</bundles_post_ra>
